<compile_context>
chip_gen: v6e
topology: v6e:2x2x1
jax: 0.10.0
libtpu: 0.0.40
codegen_flags: <defaults>
</compile_context>

<pallas_src>
import functools

import jax
import jax.numpy as jnp
from jax import lax
from jax.experimental import pallas as pl
from jax.experimental.pallas import tpu as pltpu

# ---------------- config (small synthetic sizes) ----------------
IMG = 16
PATCH = 4
IN_CHANS = 3
EMBED = 32
DEPTH = 2
NUM_CLASSES = 10
D_STATE = 16
D_CONV = 4
EXPAND = 2
D_INNER = EXPAND * EMBED                 # 64
DT_RANK = max(1, (EMBED + 15) // 16)     # ceil(EMBED / 16) = 2
EPS = 1e-5


def _sigmoid(x):
    return 1.0 / (1.0 + jnp.exp(-x))


def _softplus(x):
    # exp argument clamped so the unselected branch never produces inf.
    return jnp.where(x > 20.0, x, jnp.log1p(jnp.exp(jnp.minimum(x, 20.0))))


# ======================= fused all-depth Vim kernel =======================

def vim_stack_kernel(tok_ref, lnw_ref, lnb_ref, inw_ref, convw_ref, convb_ref,
                     wdtb_ref, bdt_ref, wc_ref, a_ref, dskip_ref, outw_ref,
                     out_ref,
                     hid_scr, res_scr, dA_scr, dBu_scr, y_scr,
                     *, d_state, d_conv, d_inner, eps):
    """grid = (batch, depth).  One Vim block (Add -> LN -> Mamba mixer) per
    grid step; hidden/residual stay resident in VMEM scratch across depth."""
    d = pl.program_id(1)
    n_layers = pl.num_programs(1)
    L = tok_ref.shape[1]

    # ---- depth == 0: hidden := patch tokens, residual := 0 (so r == tok) ----
    @pl.when(d == 0)
    def _():
        hid_scr[...] = tok_ref[0]
        res_scr[...] = jnp.zeros_like(res_scr)

    # ---- Add -> LayerNorm (prenorm residual update) ----
    r = res_scr[...] + hid_scr[...]                      # (L, D)
    res_scr[...] = r
    mu = jnp.mean(r, axis=-1, keepdims=True)
    cen = r - mu
    var = jnp.mean(cen * cen, axis=-1, keepdims=True)
    xn = cen * lax.rsqrt(var + eps) * lnw_ref[0] + lnb_ref[0]

    # ---- in_proj -> x, z (one 128-lane GEMM) ----
    xz = jnp.dot(xn, inw_ref[0], preferred_element_type=jnp.float32)  # (L, 2*d_inner)
    x = xz[:, :d_inner]
    z = xz[:, d_inner:]

    # ---- causal depthwise conv1d + SiLU (in-vreg shifted adds, no pad buf) ----
    conv_w = convw_ref[0]                                # (d_conv, d_inner)
    row = lax.broadcasted_iota(jnp.int32, (L, d_inner), 0)
    acc = jnp.broadcast_to(convb_ref[0], (L, d_inner))
    for k in range(d_conv):                              # static taps
        s = d_conv - 1 - k
        if s == 0:
            acc = acc + x * conv_w[k:k + 1, :]
        else:
            xs = pltpu.roll(x, shift=s, axis=0)          # x[t - s] (wrapped)
            acc = acc + jnp.where(row >= s, xs, 0.0) * conv_w[k:k + 1, :]
    xc = acc * _sigmoid(acc)                             # (L, d_inner)

    # ---- x_proj: fused [dt_eff | B] GEMM (dt low-rank chain pre-folded) ----
    xp = jnp.dot(xc, wdtb_ref[0], preferred_element_type=jnp.float32)  # (L, d_inner+d_state)
    dtv = _softplus(xp[:, :d_inner] + bdt_ref[0])        # (L, d_inner)
    b_all = xp[:, d_inner:]                              # (L, d_state)
    # C produced already transposed: (d_state, L)
    c_mat = lax.dot_general(wc_ref[0], xc, (((1,), (1,)), ((), ())),
                            preferred_element_type=jnp.float32)

    # ---- hoist transcendentals / outer products out of the recurrence ----
    a_mat = a_ref[0]                                     # (d_state, d_inner)
    dA_scr[...] = jnp.exp(dtv[:, None, :] * a_mat[None, :, :])     # (L, d_state, d_inner)
    dBu_scr[...] = (dtv * xc)[:, None, :] * b_all[:, :, None]      # (L, d_state, d_inner)

    # ---- sequential selective scan (fully unrolled; pure VPU fma chain) ----
    col_ids = lax.broadcasted_iota(jnp.int32, (d_state, L), 1)

    def step(t, h):
        h = dA_scr[t] * h + dBu_scr[t]                   # (d_state, d_inner)
        c_col = jnp.sum(jnp.where(col_ids == t, c_mat, 0.0),
                        axis=1, keepdims=True)           # (d_state, 1) column pick
        y_scr[pl.ds(t, 1), :] = jnp.sum(c_col * h, axis=0, keepdims=True)
        return h

    lax.fori_loop(0, L, step, jnp.zeros((d_state, d_inner), jnp.float32),
                  unroll=True)

    # ---- D*x skip, SiLU(z) gating, out_proj ----
    y = y_scr[...] + xc * dskip_ref[0]
    y = y * (z * _sigmoid(z))
    hid_new = jnp.dot(y, outw_ref[0], preferred_element_type=jnp.float32)  # (L, D)
    hid_scr[...] = hid_new

    # ---- write packed [hidden | residual] once, at the last layer ----
    d_model = hid_new.shape[1]

    @pl.when(d == n_layers - 1)
    def _():
        out_ref[0, :, :d_model] = hid_new
        out_ref[0, :, d_model:] = r


# ======================= pallas_call wrapper =======================

def vim_blocks(tok, lp):
    """Run all DEPTH Vim blocks in one pallas_call.
    Returns (B, L, 2*D) packed [hidden | residual] of the last block."""
    B, L, D = tok.shape
    depth = lp['ln_w'].shape[0]
    kern = functools.partial(vim_stack_kernel, d_state=D_STATE, d_conv=D_CONV,
                             d_inner=D_INNER, eps=EPS)

    def wspec(shape):
        zeros = (0,) * (len(shape) - 1)
        return pl.BlockSpec(shape, lambda b, d, _z=zeros: (d,) + _z)

    seq_spec = pl.BlockSpec((1, L, D), lambda b, d: (b, 0, 0))
    out_spec = pl.BlockSpec((1, L, 2 * D), lambda b, d: (b, 0, 0))

    in_specs = [
        seq_spec,                                              # patch tokens
        wspec((1, 1, D)), wspec((1, 1, D)),                    # ln_w, ln_b
        wspec((1, D, 2 * D_INNER)),                            # in_proj
        wspec((1, D_CONV, D_INNER)), wspec((1, 1, D_INNER)),   # conv w, b
        wspec((1, D_INNER, D_INNER + D_STATE)),                # x_proj [dt_eff | B]
        wspec((1, 1, D_INNER)),                                # dt_proj bias
        wspec((1, D_STATE, D_INNER)),                          # x_proj C rows (transposed)
        wspec((1, D_STATE, D_INNER)),                          # A (= -exp(A_log)^T)
        wspec((1, 1, D_INNER)),                                # D skip
        wspec((1, D_INNER, D)),                                # out_proj
    ]
    return pl.pallas_call(
        kern,
        grid=(B, depth),
        in_specs=in_specs,
        out_specs=out_spec,
        out_shape=jax.ShapeDtypeStruct((B, L, 2 * D), jnp.float32),
        scratch_shapes=[
            pltpu.VMEM((L, D), jnp.float32),                   # hidden (resident across depth)
            pltpu.VMEM((L, D), jnp.float32),                   # residual (resident across depth)
            pltpu.VMEM((L, D_STATE, D_INNER), jnp.float32),    # exp(dt*A) precompute
            pltpu.VMEM((L, D_STATE, D_INNER), jnp.float32),    # dt*x*B precompute
            pltpu.VMEM((L, D_INNER), jnp.float32),             # scan output y
        ],
        compiler_params=pltpu.CompilerParams(
            dimension_semantics=("parallel", "arbitrary")),
    )(tok, lp['ln_w'], lp['ln_b'], lp['in_w'], lp['conv_w'], lp['conv_b'],
      lp['W_dtB'], lp['b_dt_proj'], lp['W_C'], lp['A'], lp['D'], lp['out_w'])


# ======================= model glue =======================

def init_params(key):
    keys = jax.random.split(key, 3)

    def nrm(k, shape, std=0.02):
        return std * jax.random.normal(k, shape, dtype=jnp.float32)

    patch_dim = IN_CHANS * PATCH * PATCH
    params = {
        'patch_w': nrm(keys[0], (patch_dim, EMBED)),
        'patch_b': jnp.zeros((1, EMBED), jnp.float32),
        'normf_w': jnp.ones((1, EMBED), jnp.float32),
        'normf_b': jnp.zeros((1, EMBED), jnp.float32),
        'head_w': nrm(keys[1], (EMBED, NUM_CLASSES)),
        'head_b': jnp.zeros((1, NUM_CLASSES), jnp.float32),
    }
    lk = jax.random.split(keys[2], 8)
    # per-layer weights stacked along a leading depth axis (one pallas_call)
    W_dt_in = nrm(lk[2], (DEPTH, D_INNER, DT_RANK), std=0.1)
    W_dt_proj = nrm(lk[3], (DEPTH, DT_RANK, D_INNER), std=0.1)
    W_B = nrm(lk[4], (DEPTH, D_INNER, D_STATE), std=0.1)
    # fold the degenerate dt_rank GEMM chain and fuse with the B rows
    W_dt_eff = jnp.einsum('dir,drj->dij', W_dt_in, W_dt_proj)  # (DEPTH, d_inner, d_inner)
    params['layers'] = {
        'ln_w': jnp.ones((DEPTH, 1, EMBED), jnp.float32),
        'ln_b': jnp.zeros((DEPTH, 1, EMBED), jnp.float32),
        'in_w': nrm(lk[0], (DEPTH, EMBED, 2 * D_INNER)),        # in_proj (no bias)
        'conv_w': nrm(lk[1], (DEPTH, D_CONV, D_INNER), std=0.2),
        'conv_b': jnp.zeros((DEPTH, 1, D_INNER), jnp.float32),
        'W_dtB': jnp.concatenate([W_dt_eff, W_B], axis=-1),     # fused x_proj [dt_eff | B]
        'b_dt_proj': (jnp.full((DEPTH, 1, D_INNER), -4.6, jnp.float32)
                      + nrm(lk[5], (DEPTH, 1, D_INNER), std=0.01)),
        'W_C': nrm(lk[6], (DEPTH, D_STATE, D_INNER), std=0.1),  # x_proj C rows (transposed)
        # A_log = log(arange(1, d_state+1)) per channel -> A = -exp(A_log)
        'A': -jnp.broadcast_to(
            jnp.arange(1, D_STATE + 1, dtype=jnp.float32)[None, :, None],
            (DEPTH, D_STATE, D_INNER)),
        'D': jnp.ones((DEPTH, 1, D_INNER), jnp.float32),
        'out_w': nrm(lk[7], (DEPTH, D_INNER, EMBED)),           # out_proj (no bias)
    }
    return params


@jax.jit
def vision_mamba_forward(x_img, params):
    B, C, H, W = x_img.shape
    gh, gw = H // PATCH, W // PATCH
    L = gh * gw
    # PatchEmbed: Conv2d(kernel=patch, stride=patch) == patchify + linear.
    # Tiny, unaligned GEMM -> plain XLA (a dedicated pallas_call is pure
    # launch overhead).
    patches = (x_img.reshape(B, C, gh, PATCH, gw, PATCH)
               .transpose(0, 2, 4, 1, 3, 5)
               .reshape(B * L, C * PATCH * PATCH))
    tok = (patches @ params['patch_w'] + params['patch_b']).reshape(B, L, EMBED)

    # TODO(synk): DropPath / random cls-token position / token shuffling are
    # stochastic training-time features; cls token / abs pos embed / RoPE /
    # bidirectional path are disabled in this default config.
    packed = vim_blocks(tok, params['layers'])        # (B, L, 2*D) = [hidden | residual]

    # Final Add -> LayerNorm; final_pool_type='none' keeps [:, -1, :].
    # Only the last token matters, so this tail (2x32) stays in plain XLA.
    hid_last = packed[:, -1, :EMBED]
    res_last = packed[:, -1, EMBED:]
    r_last = res_last + hid_last
    mu = jnp.mean(r_last, axis=-1, keepdims=True)
    cc = r_last - mu
    var = jnp.mean(cc * cc, axis=-1, keepdims=True)
    feats = cc * lax.rsqrt(var + EPS) * params['normf_w'] + params['normf_b']
    logits = feats @ params['head_w'] + params['head_b']   # tiny head: plain XLA
    return logits


if __name__ == "__main__":
    key = jax.random.PRNGKey(0)
    pkey, xkey = jax.random.split(key)
    params = init_params(pkey)
    x = jax.random.normal(xkey, (2, IN_CHANS, IMG, IMG), dtype=jnp.float32)
    logits = vision_mamba_forward(x, params)
    jax.block_until_ready(logits)
    assert logits.shape == (2, NUM_CLASSES)
    assert bool(jnp.all(jnp.isfinite(logits)))
    print("KERNEL_OK")
</pallas_src>

<mosaic_0001>
module attributes {stable_mosaic.version = 11 : i64} {
  func.func @vim_stack_kernel(%arg0: i32, %arg1: i32, %arg2: memref<1x16x32xf32, #tpu.memory_space<vmem>>, %arg3: memref<1x1x32xf32, #tpu.memory_space<vmem>>, %arg4: memref<1x1x32xf32, #tpu.memory_space<vmem>>, %arg5: memref<1x32x128xf32, #tpu.memory_space<vmem>>, %arg6: memref<1x4x64xf32, #tpu.memory_space<vmem>>, %arg7: memref<1x1x64xf32, #tpu.memory_space<vmem>>, %arg8: memref<1x64x80xf32, #tpu.memory_space<vmem>>, %arg9: memref<1x1x64xf32, #tpu.memory_space<vmem>>, %arg10: memref<1x16x64xf32, #tpu.memory_space<vmem>>, %arg11: memref<1x16x64xf32, #tpu.memory_space<vmem>>, %arg12: memref<1x1x64xf32, #tpu.memory_space<vmem>>, %arg13: memref<1x64x32xf32, #tpu.memory_space<vmem>>, %arg14: memref<1x16x64xf32, #tpu.memory_space<vmem>>, %arg15: memref<16x32xf32, #tpu.memory_space<vmem>>, %arg16: memref<16x32xf32, #tpu.memory_space<vmem>>, %arg17: memref<16x16x64xf32, #tpu.memory_space<vmem>>, %arg18: memref<16x16x64xf32, #tpu.memory_space<vmem>>, %arg19: memref<16x64xf32, #tpu.memory_space<vmem>>) attributes {dimension_semantics = [#tpu.dimension_semantics<parallel>, #tpu.dimension_semantics<arbitrary>], iteration_bounds = array<i64: 2, 2>, scalar_prefetch = 0 : i64, scratch_operands = 5 : i64, tpu.core_type = #tpu.core_type<tc>, window_params = [{transform_indices = @transform_0, window_bounds = array<i64: 1, 16, 32>}, {transform_indices = @transform_1, window_bounds = array<i64: 1, 1, 32>}, {transform_indices = @transform_2, window_bounds = array<i64: 1, 1, 32>}, {transform_indices = @transform_3, window_bounds = array<i64: 1, 32, 128>}, {transform_indices = @transform_4, window_bounds = array<i64: 1, 4, 64>}, {transform_indices = @transform_5, window_bounds = array<i64: 1, 1, 64>}, {transform_indices = @transform_6, window_bounds = array<i64: 1, 64, 80>}, {transform_indices = @transform_7, window_bounds = array<i64: 1, 1, 64>}, {transform_indices = @transform_8, window_bounds = array<i64: 1, 16, 64>}, {transform_indices = @transform_9, window_bounds = array<i64: 1, 16, 64>}, {transform_indices = @transform_10, window_bounds = array<i64: 1, 1, 64>}, {transform_indices = @transform_11, window_bounds = array<i64: 1, 64, 32>}, {transform_indices = @transform_12, window_bounds = array<i64: 1, 16, 64>}]} {
    %c0_i32 = arith.constant 0 : i32
    %0 = arith.cmpi eq, %arg1, %c0_i32 : i32
    %1 = arith.extui %0 : i1 to i32
    %c0_i32_0 = arith.constant 0 : i32
    %2 = arith.cmpi ne, %1, %c0_i32_0 : i32
    scf.if %2 {
      %c0_206 = arith.constant 0 : index
      %c0_207 = arith.constant 0 : index
      %c0_208 = arith.constant 0 : index
      %461 = vector.load %arg2[%c0_206, %c0_207, %c0_208] : memref<1x16x32xf32, #tpu.memory_space<vmem>>, vector<1x16x32xf32>
      %462 = vector.shape_cast %461 : vector<1x16x32xf32> to vector<16x32xf32>
      %c0_209 = arith.constant 0 : index
      %c0_210 = arith.constant 0 : index
      %463 = vector.load %arg15[%c0_209, %c0_210] : memref<16x32xf32, #tpu.memory_space<vmem>>, vector<16x32xf32>
      tpu.vector_store %arg15[%c0_209, %c0_210], %462 {strides = array<i32>} : memref<16x32xf32, #tpu.memory_space<vmem>>, vector<16x32xf32>,
      %cst_211 = arith.constant 0.000000e+00 : f32
      %464 = vector.broadcast %cst_211 : f32 to vector<16x32xf32>
      %c0_212 = arith.constant 0 : index
      %c0_213 = arith.constant 0 : index
      %465 = vector.load %arg16[%c0_212, %c0_213] : memref<16x32xf32, #tpu.memory_space<vmem>>, vector<16x32xf32>
      tpu.vector_store %arg16[%c0_212, %c0_213], %464 {strides = array<i32>} : memref<16x32xf32, #tpu.memory_space<vmem>>, vector<16x32xf32>,
    } else {
    }
    %c0 = arith.constant 0 : index
    %c0_1 = arith.constant 0 : index
    %3 = vector.load %arg16[%c0, %c0_1] : memref<16x32xf32, #tpu.memory_space<vmem>>, vector<16x32xf32>
    %c0_2 = arith.constant 0 : index
    %c0_3 = arith.constant 0 : index
    %4 = vector.load %arg15[%c0_2, %c0_3] : memref<16x32xf32, #tpu.memory_space<vmem>>, vector<16x32xf32>
    %5 = arith.addf %3, %4 : vector<16x32xf32>
    %c0_4 = arith.constant 0 : index
    %c0_5 = arith.constant 0 : index
    %6 = vector.load %arg16[%c0_4, %c0_5] : memref<16x32xf32, #tpu.memory_space<vmem>>, vector<16x32xf32>
    tpu.vector_store %arg16[%c0_4, %c0_5], %5 {strides = array<i32>} : memref<16x32xf32, #tpu.memory_space<vmem>>, vector<16x32xf32>,
    %cst = arith.constant dense<0.000000e+00> : vector<16xf32>
    %7 = vector.multi_reduction <add>, %5, %cst [1] : vector<16x32xf32> to vector<16xf32>
    %8 = vector.shape_cast %7 : vector<16xf32> to vector<16x1xf32>
    %cst_6 = arith.constant 3.200000e+01 : f32
    %9 = vector.broadcast %cst_6 : f32 to vector<16x1xf32>
    %10 = arith.divf %8, %9 : vector<16x1xf32>
    %11 = vector.broadcast %10 : vector<16x1xf32> to vector<16x32xf32>
    %12 = arith.subf %5, %11 : vector<16x32xf32>
    %13 = arith.mulf %12, %12 : vector<16x32xf32>
    %cst_7 = arith.constant dense<0.000000e+00> : vector<16xf32>
    %14 = vector.multi_reduction <add>, %13, %cst_7 [1] : vector<16x32xf32> to vector<16xf32>
    %15 = vector.shape_cast %14 : vector<16xf32> to vector<16x1xf32>
    %cst_8 = arith.constant 3.200000e+01 : f32
    %16 = vector.broadcast %cst_8 : f32 to vector<16x1xf32>
    %17 = arith.divf %15, %16 : vector<16x1xf32>
    %cst_9 = arith.constant 9.99999974E-6 : f32
    %18 = vector.broadcast %cst_9 : f32 to vector<16x1xf32>
    %19 = arith.addf %17, %18 : vector<16x1xf32>
    %20 = math.rsqrt %19 : vector<16x1xf32>
    %21 = vector.broadcast %20 : vector<16x1xf32> to vector<16x32xf32>
    %22 = arith.mulf %12, %21 : vector<16x32xf32>
    %c0_10 = arith.constant 0 : index
    %c0_11 = arith.constant 0 : index
    %c0_12 = arith.constant 0 : index
    %23 = vector.load %arg3[%c0_10, %c0_11, %c0_12] : memref<1x1x32xf32, #tpu.memory_space<vmem>>, vector<1x1x32xf32>
    %24 = vector.shape_cast %23 : vector<1x1x32xf32> to vector<1x32xf32>
    %25 = vector.broadcast %24 : vector<1x32xf32> to vector<16x32xf32>
    %26 = arith.mulf %22, %25 : vector<16x32xf32>
    %c0_13 = arith.constant 0 : index
    %c0_14 = arith.constant 0 : index
    %c0_15 = arith.constant 0 : index
    %27 = vector.load %arg4[%c0_13, %c0_14, %c0_15] : memref<1x1x32xf32, #tpu.memory_space<vmem>>, vector<1x1x32xf32>
    %28 = vector.shape_cast %27 : vector<1x1x32xf32> to vector<1x32xf32>
    %29 = vector.broadcast %28 : vector<1x32xf32> to vector<16x32xf32>
    %30 = arith.addf %26, %29 : vector<16x32xf32>
    %c0_16 = arith.constant 0 : index
    %c0_17 = arith.constant 0 : index
    %c0_18 = arith.constant 0 : index
    %31 = vector.load %arg5[%c0_16, %c0_17, %c0_18] : memref<1x32x128xf32, #tpu.memory_space<vmem>>, vector<1x32x128xf32>
    %32 = vector.shape_cast %31 : vector<1x32x128xf32> to vector<32x128xf32>
    %cst_19 = arith.constant dense<0.000000e+00> : vector<16x128xf32>
    %33 = tpu.matmul %30, %32, %cst_19 {dimension_numbers = #tpu.dot_dimension_numbers<[1], [0], [0], [1], [0, 0, 1, 1], [], []>} : vector<16x32xf32>, vector<32x128xf32>, vector<16x128xf32> -> vector<16x128xf32>
    %34 = vector.extract_strided_slice %33 {offsets = [0, 0], sizes = [16, 64], strides = [1, 1]} : vector<16x128xf32> to vector<16x64xf32>
    %35 = vector.extract_strided_slice %33 {offsets = [0, 64], sizes = [16, 64], strides = [1, 1]} : vector<16x128xf32> to vector<16x64xf32>
    %c0_20 = arith.constant 0 : index
    %c0_21 = arith.constant 0 : index
    %c0_22 = arith.constant 0 : index
    %36 = vector.load %arg6[%c0_20, %c0_21, %c0_22] : memref<1x4x64xf32, #tpu.memory_space<vmem>>, vector<1x4x64xf32>
    %37 = vector.shape_cast %36 : vector<1x4x64xf32> to vector<4x64xf32>
    %38 = tpu.iota {dimensions = array<i32: 0>} : vector<16x64xi32>
    %c0_23 = arith.constant 0 : index
    %c0_24 = arith.constant 0 : index
    %c0_25 = arith.constant 0 : index
    %39 = vector.load %arg7[%c0_23, %c0_24, %c0_25] : memref<1x1x64xf32, #tpu.memory_space<vmem>>, vector<1x1x64xf32>
    %40 = vector.shape_cast %39 : vector<1x1x64xf32> to vector<1x64xf32>
    %41 = vector.shape_cast %40 : vector<1x64xf32> to vector<1x64xf32>
    %42 = vector.broadcast %41 : vector<1x64xf32> to vector<16x64xf32>
    %c3_i32 = arith.constant 3 : i32
    %43 = tpu.dynamic_rotate %34 by %c3_i32 dim 0 : vector<16x64xf32>, i32 -> vector<16x64xf32>
    %c3_i32_26 = arith.constant 3 : i32
    %44 = vector.broadcast %c3_i32_26 : i32 to vector<16x64xi32>
    %45 = arith.cmpi sge, %38, %44 : vector<16x64xi32>
    %cst_27 = arith.constant 0.000000e+00 : f32
    %46 = vector.broadcast %cst_27 : f32 to vector<16x64xf32>
    %47 = arith.select %45, %43, %46 : vector<16x64xi1>, vector<16x64xf32>
    %48 = vector.extract_strided_slice %37 {offsets = [0, 0], sizes = [1, 64], strides = [1, 1]} : vector<4x64xf32> to vector<1x64xf32>
    %49 = vector.broadcast %48 : vector<1x64xf32> to vector<16x64xf32>
    %50 = arith.mulf %47, %49 : vector<16x64xf32>
    %51 = arith.addf %42, %50 : vector<16x64xf32>
    %c2_i32 = arith.constant 2 : i32
    %52 = tpu.dynamic_rotate %34 by %c2_i32 dim 0 : vector<16x64xf32>, i32 -> vector<16x64xf32>
    %c2_i32_28 = arith.constant 2 : i32
    %53 = vector.broadcast %c2_i32_28 : i32 to vector<16x64xi32>
    %54 = arith.cmpi sge, %38, %53 : vector<16x64xi32>
    %cst_29 = arith.constant 0.000000e+00 : f32
    %55 = vector.broadcast %cst_29 : f32 to vector<16x64xf32>
    %56 = arith.select %54, %52, %55 : vector<16x64xi1>, vector<16x64xf32>
    %57 = vector.extract_strided_slice %37 {offsets = [1, 0], sizes = [1, 64], strides = [1, 1]} : vector<4x64xf32> to vector<1x64xf32>
    %58 = vector.broadcast %57 : vector<1x64xf32> to vector<16x64xf32>
    %59 = arith.mulf %56, %58 : vector<16x64xf32>
    %60 = arith.addf %51, %59 : vector<16x64xf32>
    %c1_i32 = arith.constant 1 : i32
    %61 = tpu.dynamic_rotate %34 by %c1_i32 dim 0 : vector<16x64xf32>, i32 -> vector<16x64xf32>
    %c1_i32_30 = arith.constant 1 : i32
    %62 = vector.broadcast %c1_i32_30 : i32 to vector<16x64xi32>
    %63 = arith.cmpi sge, %38, %62 : vector<16x64xi32>
    %cst_31 = arith.constant 0.000000e+00 : f32
    %64 = vector.broadcast %cst_31 : f32 to vector<16x64xf32>
    %65 = arith.select %63, %61, %64 : vector<16x64xi1>, vector<16x64xf32>
    %66 = vector.extract_strided_slice %37 {offsets = [2, 0], sizes = [1, 64], strides = [1, 1]} : vector<4x64xf32> to vector<1x64xf32>
    %67 = vector.broadcast %66 : vector<1x64xf32> to vector<16x64xf32>
    %68 = arith.mulf %65, %67 : vector<16x64xf32>
    %69 = arith.addf %60, %68 : vector<16x64xf32>
    %70 = vector.extract_strided_slice %37 {offsets = [3, 0], sizes = [1, 64], strides = [1, 1]} : vector<4x64xf32> to vector<1x64xf32>
    %71 = vector.broadcast %70 : vector<1x64xf32> to vector<16x64xf32>
    %72 = arith.mulf %34, %71 : vector<16x64xf32>
    %73 = arith.addf %69, %72 : vector<16x64xf32>
    %cst_32 = arith.constant 0.000000e+00 : f32
    %74 = vector.broadcast %cst_32 : f32 to vector<16x64xf32>
    %75 = arith.subf %74, %73 : vector<16x64xf32>
    %76 = math.exp %75 : vector<16x64xf32>
    %cst_33 = arith.constant 1.000000e+00 : f32
    %77 = vector.broadcast %cst_33 : f32 to vector<16x64xf32>
    %78 = arith.addf %77, %76 : vector<16x64xf32>
    %cst_34 = arith.constant 1.000000e+00 : f32
    %79 = vector.broadcast %cst_34 : f32 to vector<16x64xf32>
    %80 = arith.divf %79, %78 : vector<16x64xf32>
    %81 = arith.mulf %73, %80 : vector<16x64xf32>
    %c0_35 = arith.constant 0 : index
    %c0_36 = arith.constant 0 : index
    %c0_37 = arith.constant 0 : index
    %82 = vector.load %arg8[%c0_35, %c0_36, %c0_37] : memref<1x64x80xf32, #tpu.memory_space<vmem>>, vector<1x64x80xf32>
    %83 = vector.shape_cast %82 : vector<1x64x80xf32> to vector<64x80xf32>
    %cst_38 = arith.constant dense<0.000000e+00> : vector<16x80xf32>
    %84 = tpu.matmul %81, %83, %cst_38 {dimension_numbers = #tpu.dot_dimension_numbers<[1], [0], [0], [1], [0, 0, 1, 1], [], []>} : vector<16x64xf32>, vector<64x80xf32>, vector<16x80xf32> -> vector<16x80xf32>
    %85 = vector.extract_strided_slice %84 {offsets = [0, 0], sizes = [16, 64], strides = [1, 1]} : vector<16x80xf32> to vector<16x64xf32>
    %c0_39 = arith.constant 0 : index
    %c0_40 = arith.constant 0 : index
    %c0_41 = arith.constant 0 : index
    %86 = vector.load %arg9[%c0_39, %c0_40, %c0_41] : memref<1x1x64xf32, #tpu.memory_space<vmem>>, vector<1x1x64xf32>
    %87 = vector.shape_cast %86 : vector<1x1x64xf32> to vector<1x64xf32>
    %88 = vector.broadcast %87 : vector<1x64xf32> to vector<16x64xf32>
    %89 = arith.addf %85, %88 : vector<16x64xf32>
    %cst_42 = arith.constant 2.000000e+01 : f32
    %90 = vector.broadcast %cst_42 : f32 to vector<16x64xf32>
    %91 = arith.cmpf ogt, %89, %90 : vector<16x64xf32>
    %cst_43 = arith.constant 2.000000e+01 : f32
    %92 = vector.broadcast %cst_43 : f32 to vector<16x64xf32>
    %93 = arith.minimumf %89, %92 : vector<16x64xf32>
    %94 = math.exp %93 : vector<16x64xf32>
    %95 = math.log1p %94 : vector<16x64xf32>
    %96 = arith.select %91, %89, %95 : vector<16x64xi1>, vector<16x64xf32>
    %97 = vector.extract_strided_slice %84 {offsets = [0, 64], sizes = [16, 16], strides = [1, 1]} : vector<16x80xf32> to vector<16x16xf32>
    %c0_44 = arith.constant 0 : index
    %c0_45 = arith.constant 0 : index
    %c0_46 = arith.constant 0 : index
    %98 = vector.load %arg10[%c0_44, %c0_45, %c0_46] : memref<1x16x64xf32, #tpu.memory_space<vmem>>, vector<1x16x64xf32>
    %99 = vector.shape_cast %98 : vector<1x16x64xf32> to vector<16x64xf32>
    %cst_47 = arith.constant dense<0.000000e+00> : vector<16x16xf32>
    %100 = tpu.matmul %99, %81, %cst_47 {dimension_numbers = #tpu.dot_dimension_numbers<[1], [1], [0], [0], [0, 0, 1, 0], [], []>} : vector<16x64xf32>, vector<16x64xf32>, vector<16x16xf32> -> vector<16x16xf32>
    %c0_48 = arith.constant 0 : index
    %c0_49 = arith.constant 0 : index
    %c0_50 = arith.constant 0 : index
    %101 = vector.load %arg11[%c0_48, %c0_49, %c0_50] : memref<1x16x64xf32, #tpu.memory_space<vmem>>, vector<1x16x64xf32>
    %102 = vector.shape_cast %101 : vector<1x16x64xf32> to vector<16x64xf32>
    %103 = vector.shape_cast %96 : vector<16x64xf32> to vector<16x1x64xf32>
    %104 = vector.shape_cast %102 : vector<16x64xf32> to vector<1x16x64xf32>
    %105 = vector.broadcast %103 : vector<16x1x64xf32> to vector<16x16x64xf32>
    %106 = vector.broadcast %104 : vector<1x16x64xf32> to vector<16x16x64xf32>
    %107 = arith.mulf %105, %106 : vector<16x16x64xf32>
    %108 = math.exp %107 : vector<16x16x64xf32>
    %c0_51 = arith.constant 0 : index
    %c0_52 = arith.constant 0 : index
    %c0_53 = arith.constant 0 : index
    %109 = vector.load %arg17[%c0_51, %c0_52, %c0_53] : memref<16x16x64xf32, #tpu.memory_space<vmem>>, vector<16x16x64xf32>
    tpu.vector_store %arg17[%c0_51, %c0_52, %c0_53], %108 {strides = array<i32>} : memref<16x16x64xf32, #tpu.memory_space<vmem>>, vector<16x16x64xf32>,
    %110 = arith.mulf %96, %81 : vector<16x64xf32>
    %111 = vector.shape_cast %110 : vector<16x64xf32> to vector<16x1x64xf32>
    %112 = vector.shape_cast %97 : vector<16x16xf32> to vector<16x16x1xf32>
    %113 = vector.broadcast %111 : vector<16x1x64xf32> to vector<16x16x64xf32>
    %114 = vector.broadcast %112 : vector<16x16x1xf32> to vector<16x16x64xf32>
    %115 = arith.mulf %113, %114 : vector<16x16x64xf32>
    %c0_54 = arith.constant 0 : index
    %c0_55 = arith.constant 0 : index
    %c0_56 = arith.constant 0 : index
    %116 = vector.load %arg18[%c0_54, %c0_55, %c0_56] : memref<16x16x64xf32, #tpu.memory_space<vmem>>, vector<16x16x64xf32>
    tpu.vector_store %arg18[%c0_54, %c0_55, %c0_56], %115 {strides = array<i32>} : memref<16x16x64xf32, #tpu.memory_space<vmem>>, vector<16x16x64xf32>,
    %117 = tpu.iota {dimensions = array<i32: 1>} : vector<16x16xi32>
    %cst_57 = arith.constant 0.000000e+00 : f32
    %118 = vector.broadcast %cst_57 : f32 to vector<16x64xf32>
    %c0_i32_58 = arith.constant 0 : i32
    %119 = arith.index_cast %c0_i32_58 : i32 to index
    %c0_59 = arith.constant 0 : index
    %c0_60 = arith.constant 0 : index
    %120 = vector.load %arg17[%119, %c0_59, %c0_60] : memref<16x16x64xf32, #tpu.memory_space<vmem>>, vector<1x16x64xf32>
    %121 = vector.shape_cast %120 : vector<1x16x64xf32> to vector<16x64xf32>
    %122 = arith.mulf %121, %118 : vector<16x64xf32>
    %123 = arith.index_cast %c0_i32_58 : i32 to index
    %c0_61 = arith.constant 0 : index
    %c0_62 = arith.constant 0 : index
    %124 = vector.load %arg18[%123, %c0_61, %c0_62] : memref<16x16x64xf32, #tpu.memory_space<vmem>>, vector<1x16x64xf32>
    %125 = vector.shape_cast %124 : vector<1x16x64xf32> to vector<16x64xf32>
    %126 = arith.addf %122, %125 : vector<16x64xf32>
    %127 = vector.broadcast %c0_i32_58 : i32 to vector<16x16xi32>
    %128 = arith.cmpi eq, %117, %127 : vector<16x16xi32>
    %cst_63 = arith.constant 0.000000e+00 : f32
    %129 = vector.broadcast %cst_63 : f32 to vector<16x16xf32>
    %130 = arith.select %128, %100, %129 : vector<16x16xi1>, vector<16x16xf32>
    %cst_64 = arith.constant dense<0.000000e+00> : vector<16xf32>
    %131 = vector.multi_reduction <add>, %130, %cst_64 [1] : vector<16x16xf32> to vector<16xf32>
    %132 = vector.shape_cast %131 : vector<16xf32> to vector<16x1xf32>
    %133 = vector.broadcast %132 : vector<16x1xf32> to vector<16x64xf32>
    %134 = arith.mulf %133, %126 : vector<16x64xf32>
    %cst_65 = arith.constant dense<0.000000e+00> : vector<64xf32>
    %135 = vector.multi_reduction <add>, %134, %cst_65 [0] : vector<16x64xf32> to vector<64xf32>
    %136 = vector.shape_cast %135 : vector<64xf32> to vector<1x64xf32>
    %137 = arith.index_cast %c0_i32_58 : i32 to index
    %c0_66 = arith.constant 0 : index
    %138 = vector.load %arg19[%137, %c0_66] : memref<16x64xf32, #tpu.memory_space<vmem>>, vector<1x64xf32>
    tpu.vector_store %arg19[%137, %c0_66], %136 {strides = array<i32>} : memref<16x64xf32, #tpu.memory_space<vmem>>, vector<1x64xf32>,
    %c1_i32_67 = arith.constant 1 : i32
    %139 = arith.index_cast %c1_i32_67 : i32 to index
    %c0_68 = arith.constant 0 : index
    %c0_69 = arith.constant 0 : index
    %140 = vector.load %arg17[%139, %c0_68, %c0_69] : memref<16x16x64xf32, #tpu.memory_space<vmem>>, vector<1x16x64xf32>
    %141 = vector.shape_cast %140 : vector<1x16x64xf32> to vector<16x64xf32>
    %142 = arith.mulf %141, %126 : vector<16x64xf32>
    %143 = arith.index_cast %c1_i32_67 : i32 to index
    %c0_70 = arith.constant 0 : index
    %c0_71 = arith.constant 0 : index
    %144 = vector.load %arg18[%143, %c0_70, %c0_71] : memref<16x16x64xf32, #tpu.memory_space<vmem>>, vector<1x16x64xf32>
    %145 = vector.shape_cast %144 : vector<1x16x64xf32> to vector<16x64xf32>
    %146 = arith.addf %142, %145 : vector<16x64xf32>
    %147 = vector.broadcast %c1_i32_67 : i32 to vector<16x16xi32>
    %148 = arith.cmpi eq, %117, %147 : vector<16x16xi32>
    %cst_72 = arith.constant 0.000000e+00 : f32
    %149 = vector.broadcast %cst_72 : f32 to vector<16x16xf32>
    %150 = arith.select %148, %100, %149 : vector<16x16xi1>, vector<16x16xf32>
    %cst_73 = arith.constant dense<0.000000e+00> : vector<16xf32>
    %151 = vector.multi_reduction <add>, %150, %cst_73 [1] : vector<16x16xf32> to vector<16xf32>
    %152 = vector.shape_cast %151 : vector<16xf32> to vector<16x1xf32>
    %153 = vector.broadcast %152 : vector<16x1xf32> to vector<16x64xf32>
    %154 = arith.mulf %153, %146 : vector<16x64xf32>
    %cst_74 = arith.constant dense<0.000000e+00> : vector<64xf32>
    %155 = vector.multi_reduction <add>, %154, %cst_74 [0] : vector<16x64xf32> to vector<64xf32>
    %156 = vector.shape_cast %155 : vector<64xf32> to vector<1x64xf32>
    %157 = arith.index_cast %c1_i32_67 : i32 to index
    %c0_75 = arith.constant 0 : index
    %158 = vector.load %arg19[%157, %c0_75] : memref<16x64xf32, #tpu.memory_space<vmem>>, vector<1x64xf32>
    tpu.vector_store %arg19[%157, %c0_75], %156 {strides = array<i32>} : memref<16x64xf32, #tpu.memory_space<vmem>>, vector<1x64xf32>,
    %c2_i32_76 = arith.constant 2 : i32
    %159 = arith.index_cast %c2_i32_76 : i32 to index
    %c0_77 = arith.constant 0 : index
    %c0_78 = arith.constant 0 : index
    %160 = vector.load %arg17[%159, %c0_77, %c0_78] : memref<16x16x64xf32, #tpu.memory_space<vmem>>, vector<1x16x64xf32>
    %161 = vector.shape_cast %160 : vector<1x16x64xf32> to vector<16x64xf32>
    %162 = arith.mulf %161, %146 : vector<16x64xf32>
    %163 = arith.index_cast %c2_i32_76 : i32 to index
    %c0_79 = arith.constant 0 : index
    %c0_80 = arith.constant 0 : index
    %164 = vector.load %arg18[%163, %c0_79, %c0_80] : memref<16x16x64xf32, #tpu.memory_space<vmem>>, vector<1x16x64xf32>
    %165 = vector.shape_cast %164 : vector<1x16x64xf32> to vector<16x64xf32>
    %166 = arith.addf %162, %165 : vector<16x64xf32>
    %167 = vector.broadcast %c2_i32_76 : i32 to vector<16x16xi32>
    %168 = arith.cmpi eq, %117, %167 : vector<16x16xi32>
    %cst_81 = arith.constant 0.000000e+00 : f32
    %169 = vector.broadcast %cst_81 : f32 to vector<16x16xf32>
    %170 = arith.select %168, %100, %169 : vector<16x16xi1>, vector<16x16xf32>
    %cst_82 = arith.constant dense<0.000000e+00> : vector<16xf32>
    %171 = vector.multi_reduction <add>, %170, %cst_82 [1] : vector<16x16xf32> to vector<16xf32>
    %172 = vector.shape_cast %171 : vector<16xf32> to vector<16x1xf32>
    %173 = vector.broadcast %172 : vector<16x1xf32> to vector<16x64xf32>
    %174 = arith.mulf %173, %166 : vector<16x64xf32>
    %cst_83 = arith.constant dense<0.000000e+00> : vector<64xf32>
    %175 = vector.multi_reduction <add>, %174, %cst_83 [0] : vector<16x64xf32> to vector<64xf32>
    %176 = vector.shape_cast %175 : vector<64xf32> to vector<1x64xf32>
    %177 = arith.index_cast %c2_i32_76 : i32 to index
    %c0_84 = arith.constant 0 : index
    %178 = vector.load %arg19[%177, %c0_84] : memref<16x64xf32, #tpu.memory_space<vmem>>, vector<1x64xf32>
    tpu.vector_store %arg19[%177, %c0_84], %176 {strides = array<i32>} : memref<16x64xf32, #tpu.memory_space<vmem>>, vector<1x64xf32>,
    %c3_i32_85 = arith.constant 3 : i32
    %179 = arith.index_cast %c3_i32_85 : i32 to index
    %c0_86 = arith.constant 0 : index
    %c0_87 = arith.constant 0 : index
    %180 = vector.load %arg17[%179, %c0_86, %c0_87] : memref<16x16x64xf32, #tpu.memory_space<vmem>>, vector<1x16x64xf32>
    %181 = vector.shape_cast %180 : vector<1x16x64xf32> to vector<16x64xf32>
    %182 = arith.mulf %181, %166 : vector<16x64xf32>
    %183 = arith.index_cast %c3_i32_85 : i32 to index
    %c0_88 = arith.constant 0 : index
    %c0_89 = arith.constant 0 : index
    %184 = vector.load %arg18[%183, %c0_88, %c0_89] : memref<16x16x64xf32, #tpu.memory_space<vmem>>, vector<1x16x64xf32>
    %185 = vector.shape_cast %184 : vector<1x16x64xf32> to vector<16x64xf32>
    %186 = arith.addf %182, %185 : vector<16x64xf32>
    %187 = vector.broadcast %c3_i32_85 : i32 to vector<16x16xi32>
    %188 = arith.cmpi eq, %117, %187 : vector<16x16xi32>
    %cst_90 = arith.constant 0.000000e+00 : f32
    %189 = vector.broadcast %cst_90 : f32 to vector<16x16xf32>
    %190 = arith.select %188, %100, %189 : vector<16x16xi1>, vector<16x16xf32>
    %cst_91 = arith.constant dense<0.000000e+00> : vector<16xf32>
    %191 = vector.multi_reduction <add>, %190, %cst_91 [1] : vector<16x16xf32> to vector<16xf32>
    %192 = vector.shape_cast %191 : vector<16xf32> to vector<16x1xf32>
    %193 = vector.broadcast %192 : vector<16x1xf32> to vector<16x64xf32>
    %194 = arith.mulf %193, %186 : vector<16x64xf32>
    %cst_92 = arith.constant dense<0.000000e+00> : vector<64xf32>
    %195 = vector.multi_reduction <add>, %194, %cst_92 [0] : vector<16x64xf32> to vector<64xf32>
    %196 = vector.shape_cast %195 : vector<64xf32> to vector<1x64xf32>
    %197 = arith.index_cast %c3_i32_85 : i32 to index
    %c0_93 = arith.constant 0 : index
    %198 = vector.load %arg19[%197, %c0_93] : memref<16x64xf32, #tpu.memory_space<vmem>>, vector<1x64xf32>
    tpu.vector_store %arg19[%197, %c0_93], %196 {strides = array<i32>} : memref<16x64xf32, #tpu.memory_space<vmem>>, vector<1x64xf32>,
    %c4_i32 = arith.constant 4 : i32
    %199 = arith.index_cast %c4_i32 : i32 to index
    %c0_94 = arith.constant 0 : index
    %c0_95 = arith.constant 0 : index
    %200 = vector.load %arg17[%199, %c0_94, %c0_95] : memref<16x16x64xf32, #tpu.memory_space<vmem>>, vector<1x16x64xf32>
    %201 = vector.shape_cast %200 : vector<1x16x64xf32> to vector<16x64xf32>
    %202 = arith.mulf %201, %186 : vector<16x64xf32>
    %203 = arith.index_cast %c4_i32 : i32 to index
    %c0_96 = arith.constant 0 : index
    %c0_97 = arith.constant 0 : index
    %204 = vector.load %arg18[%203, %c0_96, %c0_97] : memref<16x16x64xf32, #tpu.memory_space<vmem>>, vector<1x16x64xf32>
    %205 = vector.shape_cast %204 : vector<1x16x64xf32> to vector<16x64xf32>
    %206 = arith.addf %202, %205 : vector<16x64xf32>
    %207 = vector.broadcast %c4_i32 : i32 to vector<16x16xi32>
    %208 = arith.cmpi eq, %117, %207 : vector<16x16xi32>
    %cst_98 = arith.constant 0.000000e+00 : f32
    %209 = vector.broadcast %cst_98 : f32 to vector<16x16xf32>
    %210 = arith.select %208, %100, %209 : vector<16x16xi1>, vector<16x16xf32>
    %cst_99 = arith.constant dense<0.000000e+00> : vector<16xf32>
    %211 = vector.multi_reduction <add>, %210, %cst_99 [1] : vector<16x16xf32> to vector<16xf32>
    %212 = vector.shape_cast %211 : vector<16xf32> to vector<16x1xf32>
    %213 = vector.broadcast %212 : vector<16x1xf32> to vector<16x64xf32>
    %214 = arith.mulf %213, %206 : vector<16x64xf32>
    %cst_100 = arith.constant dense<0.000000e+00> : vector<64xf32>
    %215 = vector.multi_reduction <add>, %214, %cst_100 [0] : vector<16x64xf32> to vector<64xf32>
    %216 = vector.shape_cast %215 : vector<64xf32> to vector<1x64xf32>
    %217 = arith.index_cast %c4_i32 : i32 to index
    %c0_101 = arith.constant 0 : index
    %218 = vector.load %arg19[%217, %c0_101] : memref<16x64xf32, #tpu.memory_space<vmem>>, vector<1x64xf32>
    tpu.vector_store %arg19[%217, %c0_101], %216 {strides = array<i32>} : memref<16x64xf32, #tpu.memory_space<vmem>>, vector<1x64xf32>,
    %c5_i32 = arith.constant 5 : i32
    %219 = arith.index_cast %c5_i32 : i32 to index
    %c0_102 = arith.constant 0 : index
    %c0_103 = arith.constant 0 : index
    %220 = vector.load %arg17[%219, %c0_102, %c0_103] : memref<16x16x64xf32, #tpu.memory_space<vmem>>, vector<1x16x64xf32>
    %221 = vector.shape_cast %220 : vector<1x16x64xf32> to vector<16x64xf32>
    %222 = arith.mulf %221, %206 : vector<16x64xf32>
    %223 = arith.index_cast %c5_i32 : i32 to index
    %c0_104 = arith.constant 0 : index
    %c0_105 = arith.constant 0 : index
    %224 = vector.load %arg18[%223, %c0_104, %c0_105] : memref<16x16x64xf32, #tpu.memory_space<vmem>>, vector<1x16x64xf32>
    %225 = vector.shape_cast %224 : vector<1x16x64xf32> to vector<16x64xf32>
    %226 = arith.addf %222, %225 : vector<16x64xf32>
    %227 = vector.broadcast %c5_i32 : i32 to vector<16x16xi32>
    %228 = arith.cmpi eq, %117, %227 : vector<16x16xi32>
    %cst_106 = arith.constant 0.000000e+00 : f32
    %229 = vector.broadcast %cst_106 : f32 to vector<16x16xf32>
    %230 = arith.select %228, %100, %229 : vector<16x16xi1>, vector<16x16xf32>
    %cst_107 = arith.constant dense<0.000000e+00> : vector<16xf32>
    %231 = vector.multi_reduction <add>, %230, %cst_107 [1] : vector<16x16xf32> to vector<16xf32>
    %232 = vector.shape_cast %231 : vector<16xf32> to vector<16x1xf32>
    %233 = vector.broadcast %232 : vector<16x1xf32> to vector<16x64xf32>
    %234 = arith.mulf %233, %226 : vector<16x64xf32>
    %cst_108 = arith.constant dense<0.000000e+00> : vector<64xf32>
    %235 = vector.multi_reduction <add>, %234, %cst_108 [0] : vector<16x64xf32> to vector<64xf32>
    %236 = vector.shape_cast %235 : vector<64xf32> to vector<1x64xf32>
    %237 = arith.index_cast %c5_i32 : i32 to index
    %c0_109 = arith.constant 0 : index
    %238 = vector.load %arg19[%237, %c0_109] : memref<16x64xf32, #tpu.memory_space<vmem>>, vector<1x64xf32>
    tpu.vector_store %arg19[%237, %c0_109], %236 {strides = array<i32>} : memref<16x64xf32, #tpu.memory_space<vmem>>, vector<1x64xf32>,
    %c6_i32 = arith.constant 6 : i32
    %239 = arith.index_cast %c6_i32 : i32 to index
    %c0_110 = arith.constant 0 : index
    %c0_111 = arith.constant 0 : index
    %240 = vector.load %arg17[%239, %c0_110, %c0_111] : memref<16x16x64xf32, #tpu.memory_space<vmem>>, vector<1x16x64xf32>
    %241 = vector.shape_cast %240 : vector<1x16x64xf32> to vector<16x64xf32>
    %242 = arith.mulf %241, %226 : vector<16x64xf32>
    %243 = arith.index_cast %c6_i32 : i32 to index
    %c0_112 = arith.constant 0 : index
    %c0_113 = arith.constant 0 : index
    %244 = vector.load %arg18[%243, %c0_112, %c0_113] : memref<16x16x64xf32, #tpu.memory_space<vmem>>, vector<1x16x64xf32>
    %245 = vector.shape_cast %244 : vector<1x16x64xf32> to vector<16x64xf32>
    %246 = arith.addf %242, %245 : vector<16x64xf32>
    %247 = vector.broadcast %c6_i32 : i32 to vector<16x16xi32>
    %248 = arith.cmpi eq, %117, %247 : vector<16x16xi32>
    %cst_114 = arith.constant 0.000000e+00 : f32
    %249 = vector.broadcast %cst_114 : f32 to vector<16x16xf32>
    %250 = arith.select %248, %100, %249 : vector<16x16xi1>, vector<16x16xf32>
    %cst_115 = arith.constant dense<0.000000e+00> : vector<16xf32>
    %251 = vector.multi_reduction <add>, %250, %cst_115 [1] : vector<16x16xf32> to vector<16xf32>
    %252 = vector.shape_cast %251 : vector<16xf32> to vector<16x1xf32>
    %253 = vector.broadcast %252 : vector<16x1xf32> to vector<16x64xf32>
    %254 = arith.mulf %253, %246 : vector<16x64xf32>
    %cst_116 = arith.constant dense<0.000000e+00> : vector<64xf32>
    %255 = vector.multi_reduction <add>, %254, %cst_116 [0] : vector<16x64xf32> to vector<64xf32>
    %256 = vector.shape_cast %255 : vector<64xf32> to vector<1x64xf32>
    %257 = arith.index_cast %c6_i32 : i32 to index
    %c0_117 = arith.constant 0 : index
    %258 = vector.load %arg19[%257, %c0_117] : memref<16x64xf32, #tpu.memory_space<vmem>>, vector<1x64xf32>
    tpu.vector_store %arg19[%257, %c0_117], %256 {strides = array<i32>} : memref<16x64xf32, #tpu.memory_space<vmem>>, vector<1x64xf32>,
    %c7_i32 = arith.constant 7 : i32
    %259 = arith.index_cast %c7_i32 : i32 to index
    %c0_118 = arith.constant 0 : index
    %c0_119 = arith.constant 0 : index
    %260 = vector.load %arg17[%259, %c0_118, %c0_119] : memref<16x16x64xf32, #tpu.memory_space<vmem>>, vector<1x16x64xf32>
    %261 = vector.shape_cast %260 : vector<1x16x64xf32> to vector<16x64xf32>
    %262 = arith.mulf %261, %246 : vector<16x64xf32>
    %263 = arith.index_cast %c7_i32 : i32 to index
    %c0_120 = arith.constant 0 : index
    %c0_121 = arith.constant 0 : index
    %264 = vector.load %arg18[%263, %c0_120, %c0_121] : memref<16x16x64xf32, #tpu.memory_space<vmem>>, vector<1x16x64xf32>
    %265 = vector.shape_cast %264 : vector<1x16x64xf32> to vector<16x64xf32>
    %266 = arith.addf %262, %265 : vector<16x64xf32>
    %267 = vector.broadcast %c7_i32 : i32 to vector<16x16xi32>
    %268 = arith.cmpi eq, %117, %267 : vector<16x16xi32>
    %cst_122 = arith.constant 0.000000e+00 : f32
    %269 = vector.broadcast %cst_122 : f32 to vector<16x16xf32>
    %270 = arith.select %268, %100, %269 : vector<16x16xi1>, vector<16x16xf32>
    %cst_123 = arith.constant dense<0.000000e+00> : vector<16xf32>
    %271 = vector.multi_reduction <add>, %270, %cst_123 [1] : vector<16x16xf32> to vector<16xf32>
    %272 = vector.shape_cast %271 : vector<16xf32> to vector<16x1xf32>
    %273 = vector.broadcast %272 : vector<16x1xf32> to vector<16x64xf32>
    %274 = arith.mulf %273, %266 : vector<16x64xf32>
    %cst_124 = arith.constant dense<0.000000e+00> : vector<64xf32>
    %275 = vector.multi_reduction <add>, %274, %cst_124 [0] : vector<16x64xf32> to vector<64xf32>
    %276 = vector.shape_cast %275 : vector<64xf32> to vector<1x64xf32>
    %277 = arith.index_cast %c7_i32 : i32 to index
    %c0_125 = arith.constant 0 : index
    %278 = vector.load %arg19[%277, %c0_125] : memref<16x64xf32, #tpu.memory_space<vmem>>, vector<1x64xf32>
    tpu.vector_store %arg19[%277, %c0_125], %276 {strides = array<i32>} : memref<16x64xf32, #tpu.memory_space<vmem>>, vector<1x64xf32>,
    %c8_i32 = arith.constant 8 : i32
    %279 = arith.index_cast %c8_i32 : i32 to index
    %c0_126 = arith.constant 0 : index
    %c0_127 = arith.constant 0 : index
    %280 = vector.load %arg17[%279, %c0_126, %c0_127] : memref<16x16x64xf32, #tpu.memory_space<vmem>>, vector<1x16x64xf32>
    %281 = vector.shape_cast %280 : vector<1x16x64xf32> to vector<16x64xf32>
    %282 = arith.mulf %281, %266 : vector<16x64xf32>
    %283 = arith.index_cast %c8_i32 : i32 to index
    %c0_128 = arith.constant 0 : index
    %c0_129 = arith.constant 0 : index
    %284 = vector.load %arg18[%283, %c0_128, %c0_129] : memref<16x16x64xf32, #tpu.memory_space<vmem>>, vector<1x16x64xf32>
    %285 = vector.shape_cast %284 : vector<1x16x64xf32> to vector<16x64xf32>
    %286 = arith.addf %282, %285 : vector<16x64xf32>
    %287 = vector.broadcast %c8_i32 : i32 to vector<16x16xi32>
    %288 = arith.cmpi eq, %117, %287 : vector<16x16xi32>
    %cst_130 = arith.constant 0.000000e+00 : f32
    %289 = vector.broadcast %cst_130 : f32 to vector<16x16xf32>
    %290 = arith.select %288, %100, %289 : vector<16x16xi1>, vector<16x16xf32>
    %cst_131 = arith.constant dense<0.000000e+00> : vector<16xf32>
    %291 = vector.multi_reduction <add>, %290, %cst_131 [1] : vector<16x16xf32> to vector<16xf32>
    %292 = vector.shape_cast %291 : vector<16xf32> to vector<16x1xf32>
    %293 = vector.broadcast %292 : vector<16x1xf32> to vector<16x64xf32>
    %294 = arith.mulf %293, %286 : vector<16x64xf32>
    %cst_132 = arith.constant dense<0.000000e+00> : vector<64xf32>
    %295 = vector.multi_reduction <add>, %294, %cst_132 [0] : vector<16x64xf32> to vector<64xf32>
    %296 = vector.shape_cast %295 : vector<64xf32> to vector<1x64xf32>
    %297 = arith.index_cast %c8_i32 : i32 to index
    %c0_133 = arith.constant 0 : index
    %298 = vector.load %arg19[%297, %c0_133] : memref<16x64xf32, #tpu.memory_space<vmem>>, vector<1x64xf32>
    tpu.vector_store %arg19[%297, %c0_133], %296 {strides = array<i32>} : memref<16x64xf32, #tpu.memory_space<vmem>>, vector<1x64xf32>,
    %c9_i32 = arith.constant 9 : i32
    %299 = arith.index_cast %c9_i32 : i32 to index
    %c0_134 = arith.constant 0 : index
    %c0_135 = arith.constant 0 : index
    %300 = vector.load %arg17[%299, %c0_134, %c0_135] : memref<16x16x64xf32, #tpu.memory_space<vmem>>, vector<1x16x64xf32>
    %301 = vector.shape_cast %300 : vector<1x16x64xf32> to vector<16x64xf32>
    %302 = arith.mulf %301, %286 : vector<16x64xf32>
    %303 = arith.index_cast %c9_i32 : i32 to index
    %c0_136 = arith.constant 0 : index
    %c0_137 = arith.constant 0 : index
    %304 = vector.load %arg18[%303, %c0_136, %c0_137] : memref<16x16x64xf32, #tpu.memory_space<vmem>>, vector<1x16x64xf32>
    %305 = vector.shape_cast %304 : vector<1x16x64xf32> to vector<16x64xf32>
    %306 = arith.addf %302, %305 : vector<16x64xf32>
    %307 = vector.broadcast %c9_i32 : i32 to vector<16x16xi32>
    %308 = arith.cmpi eq, %117, %307 : vector<16x16xi32>
    %cst_138 = arith.constant 0.000000e+00 : f32
    %309 = vector.broadcast %cst_138 : f32 to vector<16x16xf32>
    %310 = arith.select %308, %100, %309 : vector<16x16xi1>, vector<16x16xf32>
    %cst_139 = arith.constant dense<0.000000e+00> : vector<16xf32>
    %311 = vector.multi_reduction <add>, %310, %cst_139 [1] : vector<16x16xf32> to vector<16xf32>
    %312 = vector.shape_cast %311 : vector<16xf32> to vector<16x1xf32>
    %313 = vector.broadcast %312 : vector<16x1xf32> to vector<16x64xf32>
    %314 = arith.mulf %313, %306 : vector<16x64xf32>
    %cst_140 = arith.constant dense<0.000000e+00> : vector<64xf32>
    %315 = vector.multi_reduction <add>, %314, %cst_140 [0] : vector<16x64xf32> to vector<64xf32>
    %316 = vector.shape_cast %315 : vector<64xf32> to vector<1x64xf32>
    %317 = arith.index_cast %c9_i32 : i32 to index
    %c0_141 = arith.constant 0 : index
    %318 = vector.load %arg19[%317, %c0_141] : memref<16x64xf32, #tpu.memory_space<vmem>>, vector<1x64xf32>
    tpu.vector_store %arg19[%317, %c0_141], %316 {strides = array<i32>} : memref<16x64xf32, #tpu.memory_space<vmem>>, vector<1x64xf32>,
    %c10_i32 = arith.constant 10 : i32
    %319 = arith.index_cast %c10_i32 : i32 to index
    %c0_142 = arith.constant 0 : index
    %c0_143 = arith.constant 0 : index
    %320 = vector.load %arg17[%319, %c0_142, %c0_143] : memref<16x16x64xf32, #tpu.memory_space<vmem>>, vector<1x16x64xf32>
    %321 = vector.shape_cast %320 : vector<1x16x64xf32> to vector<16x64xf32>
    %322 = arith.mulf %321, %306 : vector<16x64xf32>
    %323 = arith.index_cast %c10_i32 : i32 to index
    %c0_144 = arith.constant 0 : index
    %c0_145 = arith.constant 0 : index
    %324 = vector.load %arg18[%323, %c0_144, %c0_145] : memref<16x16x64xf32, #tpu.memory_space<vmem>>, vector<1x16x64xf32>
    %325 = vector.shape_cast %324 : vector<1x16x64xf32> to vector<16x64xf32>
    %326 = arith.addf %322, %325 : vector<16x64xf32>
    %327 = vector.broadcast %c10_i32 : i32 to vector<16x16xi32>
    %328 = arith.cmpi eq, %117, %327 : vector<16x16xi32>
    %cst_146 = arith.constant 0.000000e+00 : f32
    %329 = vector.broadcast %cst_146 : f32 to vector<16x16xf32>
    %330 = arith.select %328, %100, %329 : vector<16x16xi1>, vector<16x16xf32>
    %cst_147 = arith.constant dense<0.000000e+00> : vector<16xf32>
    %331 = vector.multi_reduction <add>, %330, %cst_147 [1] : vector<16x16xf32> to vector<16xf32>
    %332 = vector.shape_cast %331 : vector<16xf32> to vector<16x1xf32>
    %333 = vector.broadcast %332 : vector<16x1xf32> to vector<16x64xf32>
    %334 = arith.mulf %333, %326 : vector<16x64xf32>
    %cst_148 = arith.constant dense<0.000000e+00> : vector<64xf32>
    %335 = vector.multi_reduction <add>, %334, %cst_148 [0] : vector<16x64xf32> to vector<64xf32>
    %336 = vector.shape_cast %335 : vector<64xf32> to vector<1x64xf32>
    %337 = arith.index_cast %c10_i32 : i32 to index
    %c0_149 = arith.constant 0 : index
    %338 = vector.load %arg19[%337, %c0_149] : memref<16x64xf32, #tpu.memory_space<vmem>>, vector<1x64xf32>
    tpu.vector_store %arg19[%337, %c0_149], %336 {strides = array<i32>} : memref<16x64xf32, #tpu.memory_space<vmem>>, vector<1x64xf32>,
    %c11_i32 = arith.constant 11 : i32
    %339 = arith.index_cast %c11_i32 : i32 to index
    %c0_150 = arith.constant 0 : index
    %c0_151 = arith.constant 0 : index
    %340 = vector.load %arg17[%339, %c0_150, %c0_151] : memref<16x16x64xf32, #tpu.memory_space<vmem>>, vector<1x16x64xf32>
    %341 = vector.shape_cast %340 : vector<1x16x64xf32> to vector<16x64xf32>
    %342 = arith.mulf %341, %326 : vector<16x64xf32>
    %343 = arith.index_cast %c11_i32 : i32 to index
    %c0_152 = arith.constant 0 : index
    %c0_153 = arith.constant 0 : index
    %344 = vector.load %arg18[%343, %c0_152, %c0_153] : memref<16x16x64xf32, #tpu.memory_space<vmem>>, vector<1x16x64xf32>
    %345 = vector.shape_cast %344 : vector<1x16x64xf32> to vector<16x64xf32>
    %346 = arith.addf %342, %345 : vector<16x64xf32>
    %347 = vector.broadcast %c11_i32 : i32 to vector<16x16xi32>
    %348 = arith.cmpi eq, %117, %347 : vector<16x16xi32>
    %cst_154 = arith.constant 0.000000e+00 : f32
    %349 = vector.broadcast %cst_154 : f32 to vector<16x16xf32>
    %350 = arith.select %348, %100, %349 : vector<16x16xi1>, vector<16x16xf32>
    %cst_155 = arith.constant dense<0.000000e+00> : vector<16xf32>
    %351 = vector.multi_reduction <add>, %350, %cst_155 [1] : vector<16x16xf32> to vector<16xf32>
    %352 = vector.shape_cast %351 : vector<16xf32> to vector<16x1xf32>
    %353 = vector.broadcast %352 : vector<16x1xf32> to vector<16x64xf32>
    %354 = arith.mulf %353, %346 : vector<16x64xf32>
    %cst_156 = arith.constant dense<0.000000e+00> : vector<64xf32>
    %355 = vector.multi_reduction <add>, %354, %cst_156 [0] : vector<16x64xf32> to vector<64xf32>
    %356 = vector.shape_cast %355 : vector<64xf32> to vector<1x64xf32>
    %357 = arith.index_cast %c11_i32 : i32 to index
    %c0_157 = arith.constant 0 : index
    %358 = vector.load %arg19[%357, %c0_157] : memref<16x64xf32, #tpu.memory_space<vmem>>, vector<1x64xf32>
    tpu.vector_store %arg19[%357, %c0_157], %356 {strides = array<i32>} : memref<16x64xf32, #tpu.memory_space<vmem>>, vector<1x64xf32>,
    %c12_i32 = arith.constant 12 : i32
    %359 = arith.index_cast %c12_i32 : i32 to index
    %c0_158 = arith.constant 0 : index
    %c0_159 = arith.constant 0 : index
    %360 = vector.load %arg17[%359, %c0_158, %c0_159] : memref<16x16x64xf32, #tpu.memory_space<vmem>>, vector<1x16x64xf32>
    %361 = vector.shape_cast %360 : vector<1x16x64xf32> to vector<16x64xf32>
    %362 = arith.mulf %361, %346 : vector<16x64xf32>
    %363 = arith.index_cast %c12_i32 : i32 to index
    %c0_160 = arith.constant 0 : index
    %c0_161 = arith.constant 0 : index
    %364 = vector.load %arg18[%363, %c0_160, %c0_161] : memref<16x16x64xf32, #tpu.memory_space<vmem>>, vector<1x16x64xf32>
    %365 = vector.shape_cast %364 : vector<1x16x64xf32> to vector<16x64xf32>
    %366 = arith.addf %362, %365 : vector<16x64xf32>
    %367 = vector.broadcast %c12_i32 : i32 to vector<16x16xi32>
    %368 = arith.cmpi eq, %117, %367 : vector<16x16xi32>
    %cst_162 = arith.constant 0.000000e+00 : f32
    %369 = vector.broadcast %cst_162 : f32 to vector<16x16xf32>
    %370 = arith.select %368, %100, %369 : vector<16x16xi1>, vector<16x16xf32>
    %cst_163 = arith.constant dense<0.000000e+00> : vector<16xf32>
    %371 = vector.multi_reduction <add>, %370, %cst_163 [1] : vector<16x16xf32> to vector<16xf32>
    %372 = vector.shape_cast %371 : vector<16xf32> to vector<16x1xf32>
    %373 = vector.broadcast %372 : vector<16x1xf32> to vector<16x64xf32>
    %374 = arith.mulf %373, %366 : vector<16x64xf32>
    %cst_164 = arith.constant dense<0.000000e+00> : vector<64xf32>
    %375 = vector.multi_reduction <add>, %374, %cst_164 [0] : vector<16x64xf32> to vector<64xf32>
    %376 = vector.shape_cast %375 : vector<64xf32> to vector<1x64xf32>
    %377 = arith.index_cast %c12_i32 : i32 to index
    %c0_165 = arith.constant 0 : index
    %378 = vector.load %arg19[%377, %c0_165] : memref<16x64xf32, #tpu.memory_space<vmem>>, vector<1x64xf32>
    tpu.vector_store %arg19[%377, %c0_165], %376 {strides = array<i32>} : memref<16x64xf32, #tpu.memory_space<vmem>>, vector<1x64xf32>,
    %c13_i32 = arith.constant 13 : i32
    %379 = arith.index_cast %c13_i32 : i32 to index
    %c0_166 = arith.constant 0 : index
    %c0_167 = arith.constant 0 : index
    %380 = vector.load %arg17[%379, %c0_166, %c0_167] : memref<16x16x64xf32, #tpu.memory_space<vmem>>, vector<1x16x64xf32>
    %381 = vector.shape_cast %380 : vector<1x16x64xf32> to vector<16x64xf32>
    %382 = arith.mulf %381, %366 : vector<16x64xf32>
    %383 = arith.index_cast %c13_i32 : i32 to index
    %c0_168 = arith.constant 0 : index
    %c0_169 = arith.constant 0 : index
    %384 = vector.load %arg18[%383, %c0_168, %c0_169] : memref<16x16x64xf32, #tpu.memory_space<vmem>>, vector<1x16x64xf32>
    %385 = vector.shape_cast %384 : vector<1x16x64xf32> to vector<16x64xf32>
    %386 = arith.addf %382, %385 : vector<16x64xf32>
    %387 = vector.broadcast %c13_i32 : i32 to vector<16x16xi32>
    %388 = arith.cmpi eq, %117, %387 : vector<16x16xi32>
    %cst_170 = arith.constant 0.000000e+00 : f32
    %389 = vector.broadcast %cst_170 : f32 to vector<16x16xf32>
    %390 = arith.select %388, %100, %389 : vector<16x16xi1>, vector<16x16xf32>
    %cst_171 = arith.constant dense<0.000000e+00> : vector<16xf32>
    %391 = vector.multi_reduction <add>, %390, %cst_171 [1] : vector<16x16xf32> to vector<16xf32>
    %392 = vector.shape_cast %391 : vector<16xf32> to vector<16x1xf32>
    %393 = vector.broadcast %392 : vector<16x1xf32> to vector<16x64xf32>
    %394 = arith.mulf %393, %386 : vector<16x64xf32>
    %cst_172 = arith.constant dense<0.000000e+00> : vector<64xf32>
    %395 = vector.multi_reduction <add>, %394, %cst_172 [0] : vector<16x64xf32> to vector<64xf32>
    %396 = vector.shape_cast %395 : vector<64xf32> to vector<1x64xf32>
    %397 = arith.index_cast %c13_i32 : i32 to index
    %c0_173 = arith.constant 0 : index
    %398 = vector.load %arg19[%397, %c0_173] : memref<16x64xf32, #tpu.memory_space<vmem>>, vector<1x64xf32>
    tpu.vector_store %arg19[%397, %c0_173], %396 {strides = array<i32>} : memref<16x64xf32, #tpu.memory_space<vmem>>, vector<1x64xf32>,
    %c14_i32 = arith.constant 14 : i32
    %399 = arith.index_cast %c14_i32 : i32 to index
    %c0_174 = arith.constant 0 : index
    %c0_175 = arith.constant 0 : index
    %400 = vector.load %arg17[%399, %c0_174, %c0_175] : memref<16x16x64xf32, #tpu.memory_space<vmem>>, vector<1x16x64xf32>
    %401 = vector.shape_cast %400 : vector<1x16x64xf32> to vector<16x64xf32>
    %402 = arith.mulf %401, %386 : vector<16x64xf32>
    %403 = arith.index_cast %c14_i32 : i32 to index
    %c0_176 = arith.constant 0 : index
    %c0_177 = arith.constant 0 : index
    %404 = vector.load %arg18[%403, %c0_176, %c0_177] : memref<16x16x64xf32, #tpu.memory_space<vmem>>, vector<1x16x64xf32>
    %405 = vector.shape_cast %404 : vector<1x16x64xf32> to vector<16x64xf32>
    %406 = arith.addf %402, %405 : vector<16x64xf32>
    %407 = vector.broadcast %c14_i32 : i32 to vector<16x16xi32>
    %408 = arith.cmpi eq, %117, %407 : vector<16x16xi32>
    %cst_178 = arith.constant 0.000000e+00 : f32
    %409 = vector.broadcast %cst_178 : f32 to vector<16x16xf32>
    %410 = arith.select %408, %100, %409 : vector<16x16xi1>, vector<16x16xf32>
    %cst_179 = arith.constant dense<0.000000e+00> : vector<16xf32>
    %411 = vector.multi_reduction <add>, %410, %cst_179 [1] : vector<16x16xf32> to vector<16xf32>
    %412 = vector.shape_cast %411 : vector<16xf32> to vector<16x1xf32>
    %413 = vector.broadcast %412 : vector<16x1xf32> to vector<16x64xf32>
    %414 = arith.mulf %413, %406 : vector<16x64xf32>
    %cst_180 = arith.constant dense<0.000000e+00> : vector<64xf32>
    %415 = vector.multi_reduction <add>, %414, %cst_180 [0] : vector<16x64xf32> to vector<64xf32>
    %416 = vector.shape_cast %415 : vector<64xf32> to vector<1x64xf32>
    %417 = arith.index_cast %c14_i32 : i32 to index
    %c0_181 = arith.constant 0 : index
    %418 = vector.load %arg19[%417, %c0_181] : memref<16x64xf32, #tpu.memory_space<vmem>>, vector<1x64xf32>
    tpu.vector_store %arg19[%417, %c0_181], %416 {strides = array<i32>} : memref<16x64xf32, #tpu.memory_space<vmem>>, vector<1x64xf32>,
    %c15_i32 = arith.constant 15 : i32
    %419 = arith.index_cast %c15_i32 : i32 to index
    %c0_182 = arith.constant 0 : index
    %c0_183 = arith.constant 0 : index
    %420 = vector.load %arg17[%419, %c0_182, %c0_183] : memref<16x16x64xf32, #tpu.memory_space<vmem>>, vector<1x16x64xf32>
    %421 = vector.shape_cast %420 : vector<1x16x64xf32> to vector<16x64xf32>
    %422 = arith.mulf %421, %406 : vector<16x64xf32>
    %423 = arith.index_cast %c15_i32 : i32 to index
    %c0_184 = arith.constant 0 : index
    %c0_185 = arith.constant 0 : index
    %424 = vector.load %arg18[%423, %c0_184, %c0_185] : memref<16x16x64xf32, #tpu.memory_space<vmem>>, vector<1x16x64xf32>
    %425 = vector.shape_cast %424 : vector<1x16x64xf32> to vector<16x64xf32>
    %426 = arith.addf %422, %425 : vector<16x64xf32>
    %427 = vector.broadcast %c15_i32 : i32 to vector<16x16xi32>
    %428 = arith.cmpi eq, %117, %427 : vector<16x16xi32>
    %cst_186 = arith.constant 0.000000e+00 : f32
    %429 = vector.broadcast %cst_186 : f32 to vector<16x16xf32>
    %430 = arith.select %428, %100, %429 : vector<16x16xi1>, vector<16x16xf32>
    %cst_187 = arith.constant dense<0.000000e+00> : vector<16xf32>
    %431 = vector.multi_reduction <add>, %430, %cst_187 [1] : vector<16x16xf32> to vector<16xf32>
    %432 = vector.shape_cast %431 : vector<16xf32> to vector<16x1xf32>
    %433 = vector.broadcast %432 : vector<16x1xf32> to vector<16x64xf32>
    %434 = arith.mulf %433, %426 : vector<16x64xf32>
    %cst_188 = arith.constant dense<0.000000e+00> : vector<64xf32>
    %435 = vector.multi_reduction <add>, %434, %cst_188 [0] : vector<16x64xf32> to vector<64xf32>
    %436 = vector.shape_cast %435 : vector<64xf32> to vector<1x64xf32>
    %437 = arith.index_cast %c15_i32 : i32 to index
    %c0_189 = arith.constant 0 : index
    %438 = vector.load %arg19[%437, %c0_189] : memref<16x64xf32, #tpu.memory_space<vmem>>, vector<1x64xf32>
    tpu.vector_store %arg19[%437, %c0_189], %436 {strides = array<i32>} : memref<16x64xf32, #tpu.memory_space<vmem>>, vector<1x64xf32>,
    %c16_i32 = arith.constant 16 : i32
    %c0_190 = arith.constant 0 : index
    %c0_191 = arith.constant 0 : index
    %439 = vector.load %arg19[%c0_190, %c0_191] : memref<16x64xf32, #tpu.memory_space<vmem>>, vector<16x64xf32>
    %c0_192 = arith.constant 0 : index
    %c0_193 = arith.constant 0 : index
    %c0_194 = arith.constant 0 : index
    %440 = vector.load %arg12[%c0_192, %c0_193, %c0_194] : memref<1x1x64xf32, #tpu.memory_space<vmem>>, vector<1x1x64xf32>
    %441 = vector.shape_cast %440 : vector<1x1x64xf32> to vector<1x64xf32>
    %442 = vector.broadcast %441 : vector<1x64xf32> to vector<16x64xf32>
    %443 = arith.mulf %81, %442 : vector<16x64xf32>
    %444 = arith.addf %439, %443 : vector<16x64xf32>
    %cst_195 = arith.constant 0.000000e+00 : f32
    %445 = vector.broadcast %cst_195 : f32 to vector<16x64xf32>
    %446 = arith.subf %445, %35 : vector<16x64xf32>
    %447 = math.exp %446 : vector<16x64xf32>
    %cst_196 = arith.constant 1.000000e+00 : f32
    %448 = vector.broadcast %cst_196 : f32 to vector<16x64xf32>
    %449 = arith.addf %448, %447 : vector<16x64xf32>
    %cst_197 = arith.constant 1.000000e+00 : f32
    %450 = vector.broadcast %cst_197 : f32 to vector<16x64xf32>
    %451 = arith.divf %450, %449 : vector<16x64xf32>
    %452 = arith.mulf %35, %451 : vector<16x64xf32>
    %453 = arith.mulf %444, %452 : vector<16x64xf32>
    %c0_198 = arith.constant 0 : index
    %c0_199 = arith.constant 0 : index
    %c0_200 = arith.constant 0 : index
    %454 = vector.load %arg13[%c0_198, %c0_199, %c0_200] : memref<1x64x32xf32, #tpu.memory_space<vmem>>, vector<1x64x32xf32>
    %455 = vector.shape_cast %454 : vector<1x64x32xf32> to vector<64x32xf32>
    %cst_201 = arith.constant dense<0.000000e+00> : vector<16x32xf32>
    %456 = tpu.matmul %453, %455, %cst_201 {dimension_numbers = #tpu.dot_dimension_numbers<[1], [0], [0], [1], [0, 0, 1, 1], [], []>} : vector<16x64xf32>, vector<64x32xf32>, vector<16x32xf32> -> vector<16x32xf32>
    %c0_202 = arith.constant 0 : index
    %c0_203 = arith.constant 0 : index
    %457 = vector.load %arg15[%c0_202, %c0_203] : memref<16x32xf32, #tpu.memory_space<vmem>>, vector<16x32xf32>
    tpu.vector_store %arg15[%c0_202, %c0_203], %456 {strides = array<i32>} : memref<16x32xf32, #tpu.memory_space<vmem>>, vector<16x32xf32>,
    %c1_i32_204 = arith.constant 1 : i32
    %458 = arith.cmpi eq, %arg1, %c1_i32_204 : i32
    %459 = arith.extui %458 : i1 to i32
    %c0_i32_205 = arith.constant 0 : i32
    %460 = arith.cmpi ne, %459, %c0_i32_205 : i32
    scf.if %460 {
      %c0_206 = arith.constant 0 : index
      %c0_207 = arith.constant 0 : index
      %c0_208 = arith.constant 0 : index
      %461 = vector.load %arg14[%c0_206, %c0_207, %c0_208] : memref<1x16x64xf32, #tpu.memory_space<vmem>>, vector<1x16x32xf32>
      %462 = vector.shape_cast %461 : vector<1x16x32xf32> to vector<16x32xf32>
      %463 = vector.shape_cast %456 : vector<16x32xf32> to vector<1x16x32xf32>
      tpu.vector_store %arg14[%c0_206, %c0_207, %c0_208], %463 {strides = array<i32>} : memref<1x16x64xf32, #tpu.memory_space<vmem>>, vector<1x16x32xf32>,
      %c0_209 = arith.constant 0 : index
      %c0_210 = arith.constant 0 : index
      %c32 = arith.constant 32 : index
      %464 = vector.load %arg14[%c0_209, %c0_210, %c32] : memref<1x16x64xf32, #tpu.memory_space<vmem>>, vector<1x16x32xf32>
      %465 = vector.shape_cast %464 : vector<1x16x32xf32> to vector<16x32xf32>
      %466 = vector.shape_cast %5 : vector<16x32xf32> to vector<1x16x32xf32>
      tpu.vector_store %arg14[%c0_209, %c0_210, %c32], %466 {strides = array<i32>} : memref<1x16x64xf32, #tpu.memory_space<vmem>>, vector<1x16x32xf32>,
    } else {
    }
    return
  }
  func.func @transform_0(%arg0: i32, %arg1: i32) -> (i32, i32, i32) {
    %c0_i32 = arith.constant 0 : i32
    %c0_i32_0 = arith.constant 0 : i32
    %c0_i32_1 = arith.constant 0 : i32
    return %arg0, %c0_i32, %c0_i32_0 : i32, i32, i32
  }
  func.func @transform_1(%arg0: i32, %arg1: i32) -> (i32, i32, i32) {
    %c0_i32 = arith.constant 0 : i32
    %c0_i32_0 = arith.constant 0 : i32
    %c0_i32_1 = arith.constant 0 : i32
    return %arg1, %c0_i32, %c0_i32_0 : i32, i32, i32
  }
  func.func @transform_2(%arg0: i32, %arg1: i32) -> (i32, i32, i32) {
    %c0_i32 = arith.constant 0 : i32
    %c0_i32_0 = arith.constant 0 : i32
    %c0_i32_1 = arith.constant 0 : i32
    return %arg1, %c0_i32, %c0_i32_0 : i32, i32, i32
  }
  func.func @transform_3(%arg0: i32, %arg1: i32) -> (i32, i32, i32) {
    %c0_i32 = arith.constant 0 : i32
    %c0_i32_0 = arith.constant 0 : i32
    %c0_i32_1 = arith.constant 0 : i32
    return %arg1, %c0_i32, %c0_i32_0 : i32, i32, i32
  }
  func.func @transform_4(%arg0: i32, %arg1: i32) -> (i32, i32, i32) {
    %c0_i32 = arith.constant 0 : i32
    %c0_i32_0 = arith.constant 0 : i32
    %c0_i32_1 = arith.constant 0 : i32
    return %arg1, %c0_i32, %c0_i32_0 : i32, i32, i32
  }
  func.func @transform_5(%arg0: i32, %arg1: i32) -> (i32, i32, i32) {
    %c0_i32 = arith.constant 0 : i32
    %c0_i32_0 = arith.constant 0 : i32
    %c0_i32_1 = arith.constant 0 : i32
    return %arg1, %c0_i32, %c0_i32_0 : i32, i32, i32
  }
  func.func @transform_6(%arg0: i32, %arg1: i32) -> (i32, i32, i32) {
    %c0_i32 = arith.constant 0 : i32
    %c0_i32_0 = arith.constant 0 : i32
    %c0_i32_1 = arith.constant 0 : i32
    return %arg1, %c0_i32, %c0_i32_0 : i32, i32, i32
  }
  func.func @transform_7(%arg0: i32, %arg1: i32) -> (i32, i32, i32) {
    %c0_i32 = arith.constant 0 : i32
    %c0_i32_0 = arith.constant 0 : i32
    %c0_i32_1 = arith.constant 0 : i32
    return %arg1, %c0_i32, %c0_i32_0 : i32, i32, i32
  }
  func.func @transform_8(%arg0: i32, %arg1: i32) -> (i32, i32, i32) {
    %c0_i32 = arith.constant 0 : i32
    %c0_i32_0 = arith.constant 0 : i32
    %c0_i32_1 = arith.constant 0 : i32
    return %arg1, %c0_i32, %c0_i32_0 : i32, i32, i32
  }
  func.func @transform_9(%arg0: i32, %arg1: i32) -> (i32, i32, i32) {
    %c0_i32 = arith.constant 0 : i32
    %c0_i32_0 = arith.constant 0 : i32
    %c0_i32_1 = arith.constant 0 : i32
    return %arg1, %c0_i32, %c0_i32_0 : i32, i32, i32
  }
  func.func @transform_10(%arg0: i32, %arg1: i32) -> (i32, i32, i32) {
    %c0_i32 = arith.constant 0 : i32
    %c0_i32_0 = arith.constant 0 : i32
    %c0_i32_1 = arith.constant 0 : i32
    return %arg1, %c0_i32, %c0_i32_0 : i32, i32, i32
  }
  func.func @transform_11(%arg0: i32, %arg1: i32) -> (i32, i32, i32) {
    %c0_i32 = arith.constant 0 : i32
    %c0_i32_0 = arith.constant 0 : i32
    %c0_i32_1 = arith.constant 0 : i32
    return %arg1, %c0_i32, %c0_i32_0 : i32, i32, i32
  }
  func.func @transform_12(%arg0: i32, %arg1: i32) -> (i32, i32, i32) {
    %c0_i32 = arith.constant 0 : i32
    %c0_i32_0 = arith.constant 0 : i32
    %c0_i32_1 = arith.constant 0 : i32
    return %arg0, %c0_i32, %c0_i32_0 : i32, i32, i32
  }
}

</mosaic_0001>

<bundles_post_ra>
// kernel: vision_mamba_forward.1
= control target key start
LH: loop header
LB: loop body
LE: loop exit
PB: predicated region body
PF: predicated region fallthrough
CT: control target
= control target key end

     0   :  { %s3008_s21 = smov 0   ;;  %s3010_s22 = smov 0   ;;  %s3868_s0 = inlined_call_operand.vmem [shape: f32[2,16,32], index: 0, kind: input, shape index: {}]   ;;  %s3869_s1 = inlined_call_operand.vmem [shape: f32[2,1,32], index: 1, kind: input, shape index: {}]   ;;  %s3870_s2 = inlined_call_operand.vmem [shape: f32[2,1,32], index: 2, kind: input, shape index: {}]   ;;  %s3871_s3 = inlined_call_operand.vmem [shape: f32[2,32,128], index: 3, kind: input, shape index: {}]   ;;  %s3872_s4 = inlined_call_operand.vmem [shape: f32[2,4,64], index: 4, kind: input, shape index: {}]   ;;  %s3873_s5 = inlined_call_operand.vmem [shape: f32[2,1,64], index: 5, kind: input, shape index: {}]   ;;  %s3874_s6 = inlined_call_operand.vmem [shape: f32[2,64,80], index: 6, kind: input, shape index: {}]   ;;  %s3875_s7 = inlined_call_operand.vmem [shape: f32[2,1,64], index: 7, kind: input, shape index: {}]   ;;  %s3876_s8 = inlined_call_operand.vmem [shape: f32[2,16,64], index: 8, kind: input, shape index: {}]   ;;  %s3877_s9 = inlined_call_operand.vmem [shape: f32[2,16,64], index: 9, kind: input, shape index: {}]   ;;  %s3878_s10 = inlined_call_operand.vmem [shape: f32[2,1,64], index: 10, kind: input, shape index: {}]   ;;  %s3879_s11 = inlined_call_operand.vmem [shape: f32[2,64,32], index: 11, kind: input, shape index: {}]   ;;  %s3880_s12 = inlined_call_operand.vmem [shape: f32[2,16,64], index: 12, kind: output, shape index: {}]  }
   0x1   :  { %3885 = sst [smem:[#allocation13_spill]] %s3868_s0  ;;  %s3012_s23 = smov 0  }
   0x2   :  { %3886 = sst [smem:[#allocation14_spill]] %s3870_s2  ;;  %s3014_s24 = smov 0  }
   0x3   :  { %3887 = sst [smem:[#allocation15_spill]] %s3871_s3  ;;  %s3016_s25 = smov 0  }
   0x4   :  { %3888 = sst [smem:[#allocation16_spill]] %s3872_s4 }
   0x5 LB: > { %3889 = sst [smem:[#allocation7_spill]] %s2921_s21  ;;  %s31_s26 = sadd.s32 1, %s2929_s23  ;;  %s2937_s25 = sphi %s3016_s25, %s22_s25   ;;  %s2933_s24 = sphi %s3014_s24, %s3910_s24   ;;  %s2929_s23 = sphi %s3012_s23, %s3909_s23   ;;  %s2925_s22 = sphi %s3010_s22, %s3908_s22   ;;  %s2921_s21 = sphi %s3008_s21, %s3907_s21  }
   0x6   : > { %3890 = sst [smem:[#allocation8_spill]] %s2929_s23  ;;  %s34_s27 = sadd.s32 1, %s2933_s24 }
   0x7   : > { %3891 = sst [smem:[#allocation9_spill]] %s2933_s24  ;;  %p32_p0 = scmp.ge.s32.totalorder %s31_s26, 2 }
   0x8   : > { %3892 = sst [smem:[#allocation10_spill]] %s2937_s25  ;;  %p2635_p1 = scmp.ge.s32.totalorder %s2937_s25, 1 }
   0x9   : > { %p473_p2 = scmp.lt.s32.totalorder %s2937_s25, 5  ;;  %s3912_s26 = smov (%p32_p0, %s31_s26), 0 }
   0xa   : > { %3893 = sst [smem:[#allocation11_spill]] %s3912_s26  ;;  %s3914_s27 = smov (!%p32_p0, %s34_s27), %s2933_s24 }
   0xb   : > { %p474_p3 = pnand %p2635_p1, %p473_p2  ;;  %p36_p4 = scmp.ge.s32.totalorder %s3914_s27, 2 }
   0xc   : > { %p559_p5 = scmp.lt.s32.totalorder (!%p474_p3), %s2925_s22, 1  ;;  %p564_p6 = scmp.lt.s32.totalorder (!%p474_p3), %s2921_s21, 1 }
   0xd   : > { %s3916_s27 = smov (%p36_p4, %s3914_s27), 0  ;;  %477 = sbr.rel (%p474_p3) target bundleno = 1444 (0x5a4), region = 68 }
   0xe   : > { %3894 = sst [smem:[#allocation12_spill]] %s3916_s27 }
   0xf   : > { %s3895_s0 = sld [smem:[#allocation13_spill]] (!%p474_p3) }
  0x10   : > { %s3897_s3 = sld [smem:[#allocation15_spill]] (!%p474_p3) }
  0x11   : > { %s3898_s4 = sld [smem:[#allocation16_spill]] (!%p474_p3) }
  0x12   : > { %s3918_s22 = smov (!%p559_p5, %s2925_s22), 1 }
  0x13   : > { %s3042_s28 = scalar_select %p564_p6, %s2921_s21, 1 }
  0x14   : > { %s2670_s29 = sshll.u32 %s3918_s22, 4 }
  0x15   : > { %s563_s14 = scalar_lea.vmem %s3895_s0, %s2670_s29  ;;  %s2671_s27 = sshll.u32 %s3042_s28, 5 }
  0x16   : > { %s3059_s23 = scalar_lea.vmem %s3897_s3, %s2671_s27  ;;  %s2640_s25 = sshll.u32 %s3042_s28, 2 }
  0x17   : > { %s3065_s30 = scalar_lea.vmem %s3898_s4, %s2640_s25  ;;  %s2672_s16 = sshll.u32 %s3042_s28, 6 }
  0x18   : > { %s3079_s24 = scalar_lea.vmem %s3874_s6, %s2672_s16  ;;  %s2673_s26 = sshll.u32 %s3042_s28, 4 }
  0x19   : > { %s3085_s21 = scalar_lea.vmem %s3876_s8, %s2673_s26  ;;  %s3090_s0 = scalar_lea.vmem %s3877_s9, %s2673_s26 }
  0x1a   : > { %s602_s17 = scalar_lea.vmem %s3878_s10, %s3042_s28  ;;  %s3099_s2 = scalar_lea.vmem %s3879_s11, %s2672_s16 }
  0x1b   : > { %s3104_s3 = scalar_lea.vmem %s3880_s12, %s2670_s29  ;;  %s3899_s27 = sld [smem:[#allocation7_spill]] }
  0x21   : > { %p2651_p7 = scmp.ne.s32.totalorder %s3899_s27, 0 }
  0x23   : > { %616 = sbr.rel (%p2651_p7) target bundleno = 43 (0x2b), region = 72 }
  0x28   : > { %v617_v0 = vld [vmem:[%s563_s14] sm:$0xff]  ;;  %vm619_vm0 = vcmask 261120   ;;  %v618_v1 = vld [vmem:[%s563_s14 + $0x8] sm:$0xff]  ;;  %v2939_v2 = vmov 0.0  }
  0x29   : > { %620 = vst.msk [vmem:[#allocation2] sm:$0xff] %vm619_vm0, %v617_v0  ;;  %621 = vst.msk [vmem:[#allocation2 + $0x8] sm:$0xff] %vm619_vm0, %v618_v1 }
  0x2a   : > { %622 = vst.msk [vmem:[#allocation3] sm:$0xff] %vm619_vm0, %v2939_v2  ;;  %623 = vst.msk [vmem:[#allocation3 + $0x8] sm:$0xff] %vm619_vm0, %v2939_v2 }
  0x2b PF: > { %vm630_vm1 = vcmask 261120   ;;  %v681_v21 = vld [vmem:[%s3059_s23 + $0x18] sm:$0xff]  ;;  %v680_v22 = vld [vmem:[%s3059_s23 + $0x10] sm:$0xff]  ;;  %v679_v23 = vld [vmem:[%s3059_s23 + $0x8] sm:$0xff]  ;;  %s3900_s14 = scalar_lea.vmem %s3869_s1, %s3042_s28  ;;  %s3901_s16 = sld [smem:[#allocation14_spill]]  ;;  %vm855_vm2 = vcmask 523264   ;;  %v764_v50 = vlaneseq }
  0x2c   : > { %2707 = vmatprep.subr.mxu1 %v681_v21  ;;  %v678_v24 = vld [vmem:[%s3059_s23] sm:$0xff]  ;;  %v854_v41 = vld [vmem:[%s3079_s24 + $0x38] sm:$0xff]  ;;  %v853_v42 = vld [vmem:[%s3079_s24 + $0x30] sm:$0xff]  ;;  %s3903_s26 = scalar_lea.vmem %s3873_s5, %s3042_s28  ;;  %s3904_s13 = scalar_lea.vmem %s3875_s7, %s3042_s28  ;;  %vm1818_vm12 = vcmask 130048  }
  0x2d   : > { %2708 = vmatpush3.msra.mxu1 %v681_v21  ;;  %v2652_v32 = vld [vmem:[%s3900_s14] ss:$0 sm:$0xff]  ;;  %v852_v43 = vld [vmem:[%s3079_s24 + $0x28] sm:$0xff]  ;;  %v850_v45 = vld [vmem:[%s3079_s24 + $0x18] sm:$0xff]  ;;  %v3150_v51 = vshrl.u32 %v764_v50, 7 }
  0x2e   : > { %2709 = vmatprep.subr.mxu1 %v680_v22  ;;  %v851_v44 = vld [vmem:[%s3079_s24 + $0x20] sm:$0xff]  ;;  %v849_v46 = vld [vmem:[%s3079_s24 + $0x10] sm:$0xff]  ;;  %v848_v47 = vld [vmem:[%s3079_s24 + $0x8] sm:$0xff] }
  0x2f   : > { %2710 = vmatpush3.msra.mxu1 %v680_v22  ;;  %v847_v48 = vld [vmem:[%s3079_s24] sm:$0xff]  ;;  %v3153_v52 = vsub.s32 0, %v3150_v51  ;;  %v3159_v55 = vsub.s32 1, %v3150_v51  ;;  %v3162_v56 = vsub.s32 3, %v3150_v51  ;;  %vm776_vm3 = vcmp.lt.s32.totalorder %v3150_v51, 3 }
  0x30   : > { %v626_v4 = vld [vmem:[#allocation2] sm:$0xff]  ;;  %v627_v7 = vld [vmem:[#allocation2 + $0x8] sm:$0xff]  ;;  %2711 = vmatprep.subr.mxu1 %v679_v23  ;;  %vm793_vm4 = vcmp.lt.s32.totalorder %v3150_v51, 2  ;;  %vm779_vm5 = vcmp.ge.s32.totalorder %v3150_v51, 3  ;;  %vm796_vm6 = vcmp.ge.s32.totalorder %v3150_v51, 2  ;;  %v3173_v60 = vsub.s32 2, %v3150_v51 }
  0x31   : > { %v624_v3 = vld [vmem:[#allocation3] sm:$0xff]  ;;  %v625_v5 = vld [vmem:[#allocation3 + $0x8] sm:$0xff]  ;;  %2712 = vmatpush3.msra.mxu1 %v679_v23  ;;  %s3902_s19 = scalar_lea.vmem %s3901_s16, %s3042_s28  ;;  %v974_v49 = vld [vmem:[%s3085_s21] sm:$0xff]  ;;  %vm810_vm7 = vcmp.lt.s32.totalorder %v3150_v51, 1  ;;  %vm813_vm8 = vcmp.ge.s32.totalorder %v3150_v51, 1  ;;  %s3905_s28 = sld [smem:[#allocation7_spill]] }
  0x32   : > { %v3107_v6 = vadd.f32 %v626_v4, %v624_v3  ;;  %v3109_v8 = vadd.f32 %v627_v7, %v625_v5  ;;  %2713 = vmatprep.subr.mxu1 %v678_v24  ;;  %v2653_v34 = vld [vmem:[%s3902_s19] ss:$0 sm:$0xff]  ;;  %2741 = vmatprep.mubr.msk.f32.mxu0 %vm855_vm2, %v974_v49 }
  0x33   : > { %2714 = vmatpush3.msra.mxu1 %v678_v24  ;;  %v763_v54 = vld [vmem:[%s3065_s30] sm:$0xf] }
  0x34   : > { %v633_v9 = vsel %vm630_vm1, %v3107_v6, 0.0  ;;  %631 = vst.msk [vmem:[#allocation3] sm:$0xff] %vm630_vm1, %v3107_v6  ;;  %632 = vst.msk [vmem:[#allocation3 + $0x8] sm:$0xff] %vm630_vm1, %v3109_v8  ;;  %v636_v10 = vsel %vm630_vm1, %v3109_v8, 0.0  ;;  %2718 = vmatprep.subr.mxu1 %v854_v41  ;;  %v786_v57 = vrot.slane %v763_v54, %v3153_v52  ;;  %v803_v2 = vrot.slane %v763_v54, %v3159_v55  ;;  %v2656_v3 = vld [vmem:[%s3903_s26] ss:$0 sm:$0xff] }
  0x35   : > { %634 = vadd.xlane.f32.xlu0 %v633_v9 }
  0x37   : > { %p2667_p8 = scmp.ne.s32.totalorder %s3905_s28, 1 }
  0x39   : > { %637 = vadd.xlane.f32.xlu0 %v636_v10 }
  0xbe   : > { %v635_v11 = vpop.xlane.xlu0 %634 }
  0xbf   : > { %v640_v12 = vmul.f32 0.03125, %v635_v11 }
  0xc1   : > { %v642_v13 = vsub.f32 %v3107_v6, %v640_v12 }
  0xc2   : > { %v638_v14 = vpop.xlane.xlu0 %637 }
  0xc3   : > { %v641_v15 = vmul.f32 0.03125, %v638_v14  ;;  %v644_v16 = vmul.f32 %v642_v13, %v642_v13 }
  0xc5   : > { %v643_v17 = vsub.f32 %v3109_v8, %v641_v15  ;;  %v646_v18 = vsel %vm630_vm1, %v644_v16, 0.0  ;;  %v828_v16 = vrot.slane %v763_v54, %v3162_v56 }
  0xc6   : > { %647 = vadd.xlane.f32.xlu1 %v646_v18 }
  0xc7   : > { %v645_v19 = vmul.f32 %v643_v17, %v643_v17 }
  0xc9   : > { %v649_v20 = vsel %vm630_vm1, %v645_v19, 0.0 }
  0xca   : > { %650 = vadd.xlane.f32.xlu1 %v649_v20 }
 0x14f   : > { %v648_v25 = vpop.xlane.xlu1 %647 }
 0x150   : > { %v652_v26 = vmul.f32 0.03125, %v648_v25 }
 0x152   : > { %v654_v27 = vadd.f32 1e-05, %v652_v26 }
 0x153   : > { %v651_v28 = vpop.xlane.xlu1 %650 }
 0x154   : > { %2807 = vrsqrt.f32 %v654_v27  ;;  %v653_v29 = vmul.f32 0.03125, %v651_v28 }
 0x156   : > { %v655_v30 = vadd.f32 1e-05, %v653_v29 }
 0x158   : > { %2809 = vrsqrt.f32 %v655_v30 }
 0x161   : > { %v2808_v31 = vpop.eup %2807 }
 0x162   : > { %v658_v33 = vmul.f32 %v2808_v31, %v642_v13  ;;  %v820_v13 = vrot.slane %v763_v54, %v3173_v60 }
 0x164   : > { %v667_v35 = vmul.f32 %v2652_v32, %v658_v33 }
 0x165   : > { %v2810_v36 = vpop.eup %2809 }
 0x166   : > { %v659_v37 = vmul.f32 %v2810_v36, %v643_v17  ;;  %v676_v38 = vadd.f32 %v2653_v34, %v667_v35 }
 0x168   : > { %v668_v39 = vmul.f32 %v2652_v32, %v659_v37  ;;  %2715 = vmatprep.mubr.msk.f32.mxu1 %vm630_vm1, %v676_v38 }
 0x16a   : > { %v677_v40 = vadd.f32 %v2653_v34, %v668_v39 }
 0x16c   : > { %2716 = vmatmul.mubr.msk.f32.vlgmr.msra.gmra.mxu1 %vm630_vm1, %v677_v40 }
 0x16d   : > { %2719 = vmatpush3.msra.mxu1 %v854_v41 }
 0x16e   : > { %2720 = vmatprep.subr.mxu1 %v853_v42 }
 0x16f   : > { %2721 = vmatpush3.msra.mxu1 %v853_v42 }
 0x170   : > { %2722 = vmatprep.subr.mxu1 %v852_v43 }
 0x171   : > { %2723 = vmatpush3.msra.mxu1 %v852_v43 }
 0x172   : > { %2724 = vmatprep.subr.mxu1 %v851_v44 }
 0x173   : > { %2725 = vmatpush3.msra.mxu1 %v851_v44 }
 0x174   : > { %2726 = vmatprep.subr.mxu1 %v850_v45 }
 0x175   : > { %2727 = vmatpush3.msra.mxu1 %v850_v45  ;;  %v975_v45 = vld [vmem:[%s3085_s21 + $0x8] sm:$0xff]  ;;  %s2941_s21 = smov 64  }
 0x176   : > { %2728 = vmatprep.subr.mxu1 %v849_v46 }
 0x177   : > { %2729 = vmatpush3.msra.mxu1 %v849_v46  ;;  %v2659_v46 = vld [vmem:[%s3904_s13] ss:$0 sm:$0xff] }
 0x178   : > { %2730 = vmatprep.subr.mxu1 %v848_v47 }
 0x179   : > { %2731 = vmatpush3.msra.mxu1 %v848_v47 }
 0x17a   : > { %2732 = vmatprep.subr.mxu1 %v847_v48 }
 0x17b   : > { %2733 = vmatpush3.msra.mxu1 %v847_v48 }
 0x22c   : > { %v3155_v53 = vpop.f32.mrf.mxu1 }
 0x22d   : > { %v775_v58 = vrot.slane %v3155_v53, 5  ;;  %v792_v61 = vrot.slane %v3155_v53, 6  ;;  %v809_v1 = vrot.slane %v3155_v53, 7  ;;  %v830_v27 = vmul.f32 %v3155_v53, %v828_v16 }
 0x22e   : > { %v3168_v59 = vpop.f32.mrf.mxu1 }
 0x22f   : > { %v774_v62 = vrot.slane %v3168_v59, 5  ;;  %v791_v63 = vrot.slane %v3168_v59, 6  ;;  %v808_v0 = vrot.slane %v3168_v59, 7  ;;  %v829_v30 = vmul.f32 %v828_v16, %v3168_v59 }
 0x231   : > { %v777_v4 = vsel %vm776_vm3, %v774_v62, %v775_v58  ;;  %v778_v5 = vsel %vm776_vm3, %v775_v58, %v774_v62  ;;  %v794_v7 = vsel %vm793_vm4, %v791_v63, %v792_v61  ;;  %v795_v9 = vsel %vm793_vm4, %v792_v61, %v791_v63 }
 0x232   : > { %v781_v10 = vsel %vm779_vm5, %v778_v5, 0.0  ;;  %v788_v11 = vmul.f32 %v786_v57, %v777_v4  ;;  %v798_v12 = vsel %vm796_vm6, %v795_v9, 0.0  ;;  %v811_v15 = vsel %vm810_vm7, %v808_v0, %v809_v1 }
 0x233   : > { %v787_v14 = vmul.f32 %v786_v57, %v781_v10  ;;  %v805_v18 = vmul.f32 %v803_v2, %v794_v7  ;;  %v812_v19 = vsel %vm810_vm7, %v809_v1, %v808_v0  ;;  %v804_v21 = vmul.f32 %v803_v2, %v798_v12 }
 0x234   : > { %v790_v17 = vadd.f32 %v2656_v3, %v788_v11  ;;  %v815_v22 = vsel %vm813_vm8, %v812_v19, 0.0  ;;  %v822_v23 = vmul.f32 %v820_v13, %v811_v15  ;;  %v1531_v5 = vsub.s32 5, %v3150_v51 }
 0x235   : > { %v789_v20 = vadd.f32 %v2656_v3, %v787_v14  ;;  %v821_v26 = vmul.f32 %v820_v13, %v815_v22  ;;  %v1519_v3 = vsub.s32 4, %v3150_v51  ;;  %v3253_v9 = vand.u32 127, %v764_v50 }
 0x236   : > { %v807_v24 = vadd.f32 %v805_v18, %v790_v17  ;;  %v1543_v14 = vsub.s32 6, %v3150_v51  ;;  %v1555_v19 = vsub.s32 7, %v3150_v51 }
 0x237   : > { %v806_v25 = vadd.f32 %v804_v21, %v789_v20  ;;  %vm2065_vm9 = vcmp.eq.s32.totalorder %v3253_v9, 8  ;;  %vm2251_vm10 = vcmp.eq.s32.totalorder %v3253_v9, 14  ;;  %vm2282_vm11 = vcmp.eq.s32.totalorder %v3253_v9, 15 }
 0x238   : > { %v824_v28 = vadd.f32 %v822_v23, %v807_v24  ;;  %vm1848_vm3 = vcmp.eq.s32.totalorder %v3253_v9, 1  ;;  %vm1815_vm4 = vcmp.eq.s32.totalorder %v3253_v9, 0  ;;  %vm1879_vm5 = vcmp.eq.s32.totalorder %v3253_v9, 2 }
 0x239   : > { %v823_v29 = vadd.f32 %v821_v26, %v806_v25  ;;  %v2940_v26 = vmov 1966171168   ;;  %vm1910_vm6 = vcmp.eq.s32.totalorder %v3253_v9, 3  ;;  %vm1941_vm7 = vcmp.eq.s32.totalorder %v3253_v9, 4 }
 0x23a   : > { %v832_v31 = vadd.f32 %v830_v27, %v824_v28  ;;  %v1063_v27 = vunpack.c.l.s4 %v2940_v26  ;;  %vm1972_vm8 = vcmp.eq.s32.totalorder %v3253_v9, 5 }
 0x23b   : > { %v831_v32 = vadd.f32 %v829_v30, %v823_v29 }
 0x23c   : > { %v834_v33 = vsub.f32 0.0, %v832_v31 }
 0x23d   : > { %v833_v34 = vsub.f32 0.0, %v831_v32 }
 0x23e   : > { %v837_v35 = vmul.f32 1.442695, %v834_v33 }
 0x23f   : > { %v835_v36 = vmul.f32 1.442695, %v833_v34 }
 0x240   : > { %2811 = vpow2.f32 %v837_v35 }
 0x241   : > { %2813 = vpow2.f32 %v835_v36 }
 0x24d   : > { %v2812_v37 = vpop.eup %2811 }
 0x24e   : > { %v2814_v38 = vpop.eup %2813  ;;  %v840_v39 = vadd.f32 1.0, %v2812_v37 }
 0x24f   : > { %v839_v40 = vadd.f32 1.0, %v2814_v38 }
 0x250   : > { %2815 = vrcp.f32 %v840_v39 }
 0x251   : > { %2817 = vrcp.f32 %v839_v40 }
 0x25d   : > { %v2816_v41 = vpop.eup %2815 }
 0x25e   : > { %v2818_v42 = vpop.eup %2817  ;;  %v3210_v43 = vmul.f32 %v2816_v41, %v832_v31  ;;  %v1064_v31 = vunpack.c.0.s8 %v1063_v27 }
 0x25f   : > { %v3212_v44 = vmul.f32 %v2818_v42, %v831_v32 }
 0x260   : > { %2737 = vmatprep.subr.msk.mxu0 %vm855_vm2, %v3210_v43  ;;  %v3295_v37 = vsub.s32 %v1064_v31, %v3150_v51 }
 0x261   : > { %2734 = vmatprep.mubr.msk.f32.mxu1 %vm855_vm2, %v3212_v44  ;;  %2738 = vmatpush3.xpose.msk.msra.mxu0 %vm855_vm2, %v3210_v43 }
 0x262   : > { %2735 = vmatmul.mubr.msk.f32.vlgmr.msra.gmra.mxu1 %vm855_vm2, %v3210_v43  ;;  %2739 = vmatprep.subr.msk.mxu0 %vm855_vm2, %v3212_v44 }
 0x265   : > { %2740 = vmatpush3.xpose.msk.msra.mxu0 %vm855_vm2, %v3212_v44 }
 0x268   : > { %2742 = vmatmul.mubr.msk.f32.vlgmr.msra.gmra.mxu0 %vm855_vm2, %v975_v45 }
 0x322   : > { %v2736_v47 = vpop.f32.mrf.mxu1 }
 0x323   : > { %v3233_v48 = vadd.f32 %v2736_v47, %v2659_v46  ;;  %v1568_v49 = vrot.slane %v2736_v47, %v3153_v52  ;;  %v1580_v63 = vrot.slane %v2736_v47, %v3159_v55  ;;  %v1592_v1 = vrot.slane %v2736_v47, %v3173_v60 }
 0x324   : > { %v3236_v54 = vpop.f32.mrf.mxu1  ;;  %v1604_v2 = vrot.slane %v2736_v47, %v3162_v56  ;;  %v1616_v4 = vrot.slane %v2736_v47, %v1519_v3  ;;  %v1628_v13 = vrot.slane %v2736_v47, %v1531_v5  ;;  %v1640_v21 = vrot.slane %v2736_v47, %v1543_v14 }
 0x325   : > { %v949_v57 = vmin.f32 %v3233_v48, 20.0  ;;  %v3240_v58 = vadd.f32 %v2659_v46, %v3236_v54  ;;  %1575 = vbcast.lane.b32.xlu1 %v1568_v49, 328  ;;  %1571 = vbcast.lane.b32.xlu0 %v1568_v49, 320  ;;  %v1652_v29 = vrot.slane %v2736_v47, %v1555_v19  ;;  %v1472_v33 = vrot.slane %v3236_v54, %v3153_v52 }
 0x326   : > { %v1484_v41 = vrot.slane %v3236_v54, %v3159_v55  ;;  %v1496_v42 = vrot.slane %v3236_v54, %v3173_v60  ;;  %vm947_vm14 = vcmp.gt.f32.partialorder %v3233_v48, 20.0  ;;  %v1508_v60 = vrot.slane %v3236_v54, %v3162_v56 }
 0x327   : > { %v952_v61 = vmul.f32 1.442695, %v949_v57  ;;  %v948_v62 = vmin.f32 %v3240_v58, 20.0  ;;  %vm946_vm0 = vcmp.gt.f32.partialorder %v3240_v58, 20.0 }
 0x328   : > { %v3250_v7 = vpop.f32.mrf.mxu0 }
 0x329   : > { %2819 = vpow2.f32 %v952_v61  ;;  %v950_v0 = vmul.f32 1.442695, %v948_v62  ;;  %1587 = vbcast.lane.b32.xlu1 %v1580_v63, 328  ;;  %1583 = vbcast.lane.b32.xlu0 %v1580_v63, 320  ;;  %v2253_v50 = vsel %vm2251_vm10, %v3250_v7, 0.0  ;;  %v2284_v24 = vsel %vm2282_vm11, %v3250_v7, 0.0 }
 0x32a   : > { %v3255_v10 = vpop.f32.mrf.mxu0  ;;  %v3274_v20 = vsel %vm1818_vm12, %v2253_v50, 0.0  ;;  %v3288_v25 = vsel %vm1818_vm12, %v2284_v24, 0.0  ;;  %v3325_v50 = vld [vmem:[%s3090_s0] sm:$0xff] }
 0x32b   : > { %2821 = vpow2.f32 %v950_v0  ;;  %v2283_v16 = vsel %vm2282_vm11, %v3255_v10, 0.0  ;;  %v2066_v17 = vsel %vm2065_vm9, %v3255_v10, 0.0  ;;  %vm2034_vm11 = vcmp.eq.s32.totalorder %v3253_v9, 7 }
 0x32c   : > { %v3279_v22 = vsel %vm1818_vm12, %v2283_v16, 0.0  ;;  %v3282_v23 = vsel %vm1818_vm12, %v2066_v17, 0.0  ;;  %v3336_v17 = vrot.slane %v3236_v54, %v1543_v14  ;;  %v3352_v14 = vrot.slane %v3236_v54, %v1555_v19 }
 0x32d   : > { %1599 = vbcast.lane.b32.xlu1 %v1592_v1, 328  ;;  %1595 = vbcast.lane.b32.xlu0 %v1592_v1, 320 }
 0x331   : > { %1611 = vbcast.lane.b32.xlu1 %v1604_v2, 328  ;;  %1607 = vbcast.lane.b32.xlu0 %v1604_v2, 320 }
 0x335   : > { %1623 = vbcast.lane.b32.xlu1 %v1616_v4, 328  ;;  %1619 = vbcast.lane.b32.xlu0 %v1616_v4, 320  ;;  %v3316_v4 = vrot.slane %v3236_v54, %v1519_v3  ;;  %v3331_v3 = vrot.slane %v3236_v54, %v1531_v5 }
 0x336   : > { %v2820_v11 = vpop.eup %2819 }
 0x337   : > { %v963_v12 = vadd.f32 1.0, %v2820_v11  ;;  %v966_v28 = vmul.f32 -0.5, %v2820_v11  ;;  %v969_v34 = vand.u32 2147483647, %v2820_v11 }
 0x338   : > { %v2822_v15 = vpop.eup %2821 }
 0x339   : > { %2823 = vlog2.f32 %v963_v12  ;;  %v954_v18 = vadd.f32 1.0, %v2822_v15  ;;  %1635 = vbcast.lane.b32.xlu1 %v1628_v13, 328  ;;  %1631 = vbcast.lane.b32.xlu0 %v1628_v13, 320  ;;  %v957_v30 = vmul.f32 -0.5, %v2822_v15  ;;  %v967_v32 = vadd.f32 1.0, %v966_v28 }
 0x33a   : > { %v960_v38 = vand.u32 2147483647, %v2822_v15  ;;  %vm970_vm13 = vcmp.lt.f32.partialorder %v969_v34, 0.0004427343 }
 0x33b   : > { %2825 = vlog2.f32 %v954_v18  ;;  %v958_v35 = vadd.f32 1.0, %v957_v30  ;;  %v968_v40 = vmul.f32 %v2820_v11, %v967_v32  ;;  %v3339_v18 = vld [vmem:[%s3090_s0 + $0x8] sm:$0xff] }
 0x33c   : > { %vm961_vm15 = vcmp.lt.f32.partialorder %v960_v38, 0.0004427343 }
 0x33d   : > { %1647 = vbcast.lane.b32.xlu1 %v1640_v21, 328  ;;  %1643 = vbcast.lane.b32.xlu0 %v1640_v21, 320  ;;  %v959_v49 = vmul.f32 %v2822_v15, %v958_v35 }
 0x341   : > { %1659 = vbcast.lane.b32.xlu1 %v1652_v29, 328  ;;  %1655 = vbcast.lane.b32.xlu0 %v1652_v29, 320 }
 0x345   : > { %1479 = vbcast.lane.b32.xlu1 %v1472_v33, 328  ;;  %1475 = vbcast.lane.b32.xlu0 %v1472_v33, 320 }
 0x346   : > { %v2824_v36 = vpop.eup %2823 }
 0x347   : > { %v965_v39 = vmul.f32 0.6931472, %v2824_v36 }
 0x348   : > { %v2826_v45 = vpop.eup %2825 }
 0x349   : > { %v971_v46 = vsel %vm970_vm13, %v968_v40, %v965_v39  ;;  %v956_v47 = vmul.f32 0.6931472, %v2826_v45  ;;  %1487 = vbcast.lane.b32.xlu1 %v1484_v41, 320  ;;  %1499 = vbcast.lane.b32.xlu0 %v1496_v42, 320  ;;  %vm2096_vm13 = vcmp.eq.s32.totalorder %v3253_v9, 9 }
 0x34a   : > { %v973_v57 = vsel %vm947_vm14, %v3233_v48, %v971_v46  ;;  %vm2127_vm14 = vcmp.eq.s32.totalorder %v3253_v9, 10 }
 0x34b   : > { %v1110_v61 = vcombine.high %v973_v57, %v973_v57  ;;  %v1117_v62 = vrot.slane %v973_v57, %v3295_v37  ;;  %v962_v63 = vsel %vm961_vm15, %v959_v49, %v956_v47  ;;  %v3305_v55 = vmul.f32 %v973_v57, %v3210_v43 }
 0x34c   : > { %v972_v2 = vsel %vm946_vm0, %v3240_v58, %v962_v63  ;;  %vm2158_vm15 = vcmp.eq.s32.totalorder %v3253_v9, 11  ;;  %vm2189_vm0 = vcmp.eq.s32.totalorder %v3253_v9, 12 }
 0x34d   : > { %v1124_v0 = vrot.slane %v1110_v61, %v3295_v37  ;;  %v1125_v1 = vcombine.high %v1117_v62, %v1117_v62  ;;  %v1133_v48 = vrot.slane %v1117_v62, %v3295_v37  ;;  %1491 = vbcast.lane.b32.xlu1 %v1484_v41, 328  ;;  %1511 = vbcast.lane.b32.xlu0 %v1508_v60, 320 }
 0x34e   : > { %v3320_v11 = vrot.slane %v3305_v55, %v3295_v37  ;;  %v1061_v16 = vcombine.high %v972_v2, %v972_v2  ;;  %v1068_v27 = vrot.slane %v972_v2, %v3295_v37  ;;  %v3346_v5 = vmul.f32 %v972_v2, %v3212_v44 }
 0x34f   : > { %v1126_v56 = vcombine.high %v1124_v0, %v1124_v0  ;;  %v1140_v12 = vrot.slane %v1124_v0, %v3295_v37  ;;  %v1147_v13 = vrot.slane %v1125_v1, %v3295_v37  ;;  %v1155_v15 = vcombine.high %v1133_v48, %v1133_v48 }
 0x350   : > { %v1194_v58 = vrot.slane %v1133_v48, %v3153_v52  ;;  %v1420_v38 = vcombine.high %v3305_v55, %v3305_v55  ;;  %v1075_v19 = vrot.slane %v1061_v16, %v3295_v37  ;;  %v1076_v39 = vcombine.high %v1068_v27, %v1068_v27 }
 0x351   : > { %v1154_v21 = vrot.slane %v1126_v56, %v3295_v37  ;;  %v1157_v24 = vcombine.high %v1147_v13, %v1147_v13  ;;  %v1198_v26 = vrot.slane %v1147_v13, %v3153_v52  ;;  %1503 = vbcast.lane.b32.xlu1 %v1496_v42, 328  ;;  %v1156_v28 = vcombine.high %v1140_v12, %v1140_v12 }
 0x352   : > { %v1202_v29 = vrot.slane %v1155_v15, %v3153_v52  ;;  %1523 = vbcast.lane.b32.xlu0 %v3316_v4, 320  ;;  %v1210_v32 = vrot.slane %v1140_v12, %v3153_v52  ;;  %v1255_v33 = vmul.f32 %v1194_v58, %v3325_v50  ;;  %v1256_v34 = vmul.f32 %v1194_v58, %v3339_v18 }
 0x353   : > { %v1158_v30 = vcombine.high %v1154_v21, %v1154_v21  ;;  %v1206_v31 = vrot.slane %v1157_v24, %v3153_v52  ;;  %v1257_v35 = vmul.f32 %v1198_v26, %v3325_v50  ;;  %v1258_v36 = vmul.f32 %v1198_v26, %v3339_v18 }
 0x354   : > { %v1214_v51 = vrot.slane %v1154_v21, %v3153_v52  ;;  %v1259_v54 = vmul.f32 %v1202_v29, %v3325_v50  ;;  %v1218_v40 = vrot.slane %v1156_v28, %v3153_v52  ;;  %v1260_v42 = vmul.f32 %v1202_v29, %v3339_v18 }
 0x355   : > { %1515 = vbcast.lane.b32.xlu1 %v1508_v60, 328  ;;  %v1222_v41 = vrot.slane %v1158_v30, %v3153_v52  ;;  %v1084_v45 = vrot.slane %v1068_v27, %v3295_v37  ;;  %v1261_v46 = vmul.f32 %v1206_v31, %v3325_v50  ;;  %v1262_v47 = vmul.f32 %v1206_v31, %v3339_v18 }
 0x356   : > { %1535 = vbcast.lane.b32.xlu0 %v3331_v3, 320  ;;  %v1263_v49 = vmul.f32 %v1210_v32, %v3325_v50  ;;  %v1303_v57 = vmul.f32 1.442695, %v1255_v33  ;;  %v1264_v61 = vmul.f32 %v1210_v32, %v3339_v18  ;;  %v1305_v62 = vmul.f32 1.442695, %v1256_v34 }
 0x357   : > { %v1307_v63 = vmul.f32 1.442695, %v1257_v35  ;;  %v1309_v60 = vmul.f32 1.442695, %v1258_v36  ;;  %v1265_v0 = vmul.f32 %v1214_v51, %v3325_v50  ;;  %v1266_v1 = vmul.f32 %v1214_v51, %v3339_v18 }
 0x358   : > { %2827 = vpow2.f32 %v1303_v57  ;;  %v1311_v48 = vmul.f32 1.442695, %v1259_v54  ;;  %v1267_v2 = vmul.f32 %v1218_v40, %v3325_v50  ;;  %v1313_v56 = vmul.f32 1.442695, %v1260_v42 }
 0x359   : > { %2829 = vpow2.f32 %v1305_v62  ;;  %v1077_v12 = vcombine.high %v1075_v19, %v1075_v19  ;;  %v1268_v13 = vmul.f32 %v1218_v40, %v3339_v18  ;;  %v1269_v15 = vmul.f32 %v1222_v41, %v3325_v50  ;;  %1527 = vbcast.lane.b32.xlu1 %v3316_v4, 328 }
 0x35a   : > { %2831 = vpow2.f32 %v1307_v63  ;;  %v1315_v58 = vmul.f32 1.442695, %v1261_v46  ;;  %v1270_v16 = vmul.f32 %v1222_v41, %v3339_v18  ;;  %v1317_v21 = vmul.f32 1.442695, %v1262_v47  ;;  %1547 = vbcast.lane.b32.xlu0 %v3336_v17, 320 }
 0x35b   : > { %2833 = vpow2.f32 %v1309_v60  ;;  %v1319_v24 = vmul.f32 1.442695, %v1263_v49  ;;  %v1321_v26 = vmul.f32 1.442695, %v1264_v61  ;;  %v1091_v27 = vrot.slane %v1075_v19, %v3295_v37 }
 0x35c   : > { %2835 = vpow2.f32 %v1311_v48  ;;  %v1098_v28 = vrot.slane %v1076_v39, %v3295_v37  ;;  %v1323_v29 = vmul.f32 1.442695, %v1265_v0  ;;  %v1105_v30 = vrot.slane %v1077_v12, %v3295_v37 }
 0x35d   : > { %2837 = vpow2.f32 %v1313_v56  ;;  %v1106_v31 = vcombine.high %v1084_v45, %v1084_v45  ;;  %v1325_v32 = vmul.f32 1.442695, %v1266_v1  ;;  %v1162_v34 = vrot.slane %v1084_v45, %v3153_v52  ;;  %1539 = vbcast.lane.b32.xlu1 %v3331_v3, 328 }
 0x35e   : > { %2839 = vpow2.f32 %v1315_v58  ;;  %v1108_v33 = vcombine.high %v1098_v28, %v1098_v28  ;;  %v1327_v35 = vmul.f32 1.442695, %v1267_v2  ;;  %v1329_v36 = vmul.f32 1.442695, %v1268_v13  ;;  %1559 = vbcast.lane.b32.xlu0 %v3352_v14, 320 }
 0x35f   : > { %2841 = vpow2.f32 %v1317_v21  ;;  %v1166_v51 = vrot.slane %v1098_v28, %v3153_v52  ;;  %v1331_v54 = vmul.f32 1.442695, %v1269_v15  ;;  %v1107_v4 = vcombine.high %v1091_v27, %v1091_v27 }
 0x360   : > { %2843 = vpow2.f32 %v1319_v24  ;;  %v1170_v19 = vrot.slane %v1106_v31, %v3153_v52  ;;  %v1333_v39 = vmul.f32 1.442695, %v1270_v16  ;;  %v1109_v40 = vcombine.high %v1105_v30, %v1105_v30 }
 0x361   : > { %2845 = vpow2.f32 %v1321_v26  ;;  %v1174_v41 = vrot.slane %v1108_v33, %v3153_v52  ;;  %v1178_v42 = vrot.slane %v1091_v27, %v3153_v52  ;;  %v1239_v45 = vmul.f32 %v1162_v34, %v3325_v50  ;;  %1551 = vbcast.lane.b32.xlu1 %v3336_v17, 328 }
 0x362   : > { %2847 = vpow2.f32 %v1323_v29  ;;  %v1371_v46 = vcombine.high %v3346_v5, %v3346_v5  ;;  %v1240_v47 = vmul.f32 %v1162_v34, %v3339_v18  ;;  %v1241_v3 = vmul.f32 %v1166_v51, %v3325_v50 }
 0x363   : > { %2849 = vpow2.f32 %v1325_v32  ;;  %v1242_v49 = vmul.f32 %v1166_v51, %v3339_v18  ;;  %v1182_v57 = vrot.slane %v1105_v30, %v3153_v52  ;;  %v1186_v61 = vrot.slane %v1107_v4, %v3153_v52 }
 0x364   : > { %2851 = vpow2.f32 %v1327_v35  ;;  %v1243_v62 = vmul.f32 %v1170_v19, %v3325_v50  ;;  %v1190_v60 = vrot.slane %v1109_v40, %v3153_v52  ;;  %v1244_v0 = vmul.f32 %v1170_v19, %v3339_v18 }
 0x365   : > { %v2828_v63 = vpop.eup %2827  ;;  %2853 = vpow2.f32 %v1329_v36  ;;  %v1245_v1 = vmul.f32 %v1174_v41, %v3325_v50  ;;  %v1246_v2 = vmul.f32 %v1174_v41, %v3339_v18  ;;  %v1247_v56 = vmul.f32 %v1178_v42, %v3325_v50  ;;  %1563 = vbcast.lane.b32.xlu1 %v3352_v14, 328 }
 0x366   : > { %v2830_v48 = vpop.eup %2829  ;;  %2855 = vpow2.f32 %v1331_v54  ;;  %1351 = vst.msk [vmem:[#allocation4 + $0x80] sm:$0xff] %vm855_vm2, %v2828_v63  ;;  %v1271_v12 = vmul.f32 1.442695, %v1239_v45  ;;  %v1273_v17 = vmul.f32 1.442695, %v1240_v47  ;;  %v1248_v21 = vmul.f32 %v1178_v42, %v3339_v18 }
 0x367   : > { %v2832_v13 = vpop.eup %2831  ;;  %2857 = vpow2.f32 %v1333_v39  ;;  %1352 = vst.msk [vmem:[#allocation4 + $0x88] sm:$0xff] %vm855_vm2, %v2830_v48  ;;  %v1275_v15 = vmul.f32 1.442695, %v1241_v3  ;;  %v1277_v58 = vmul.f32 1.442695, %v1242_v49  ;;  %v1249_v24 = vmul.f32 %v1182_v57, %v3325_v50 }
 0x368   : > { %v2834_v16 = vpop.eup %2833  ;;  %1353 = vst.msk [vmem:[#allocation4 + $0x90] sm:$0xff] %vm855_vm2, %v2832_v13  ;;  %2859 = vpow2.f32 %v1271_v12  ;;  %v1279_v26 = vmul.f32 1.442695, %v1243_v62  ;;  %v1250_v28 = vmul.f32 %v1182_v57, %v3339_v18  ;;  %v1251_v29 = vmul.f32 %v1186_v61, %v3325_v50 }
 0x369   : > { %v2836_v27 = vpop.eup %2835  ;;  %1354 = vst.msk [vmem:[#allocation4 + $0x98] sm:$0xff] %vm855_vm2, %v2834_v16  ;;  %2861 = vpow2.f32 %v1273_v17  ;;  %v1281_v30 = vmul.f32 1.442695, %v1244_v0  ;;  %v1252_v32 = vmul.f32 %v1186_v61, %v3339_v18  ;;  %v1253_v33 = vmul.f32 %v1190_v60, %v3325_v50 }
 0x36a   : > { %v2838_v31 = vpop.eup %2837  ;;  %1355 = vst.msk [vmem:[#allocation4 + $0xa0] sm:$0xff] %vm855_vm2, %v2836_v27  ;;  %2863 = vpow2.f32 %v1275_v15  ;;  %v1283_v34 = vmul.f32 1.442695, %v1245_v1  ;;  %v1254_v36 = vmul.f32 %v1190_v60, %v3339_v18  ;;  %v1285_v51 = vmul.f32 1.442695, %v1246_v2 }
 0x36b   : > { %v2840_v35 = vpop.eup %2839  ;;  %1356 = vst.msk [vmem:[#allocation4 + $0xa8] sm:$0xff] %vm855_vm2, %v2838_v31  ;;  %2865 = vpow2.f32 %v1277_v58  ;;  %v1287_v54 = vmul.f32 1.442695, %v1247_v56  ;;  %v1378_v19 = vrot.slane %v3346_v5, %v3295_v37  ;;  %v1385_v39 = vrot.slane %v1371_v46, %v3295_v37 }
 0x36c   : > { %v2842_v4 = vpop.eup %2841  ;;  %1357 = vst.msk [vmem:[#allocation4 + $0xb0] sm:$0xff] %vm855_vm2, %v2840_v35  ;;  %2867 = vpow2.f32 %v1279_v26  ;;  %v3427_v50 = vrot.slane %v3320_v11, %v3295_v37  ;;  %v1289_v18 = vmul.f32 1.442695, %v1248_v21  ;;  %v1435_v41 = vcombine.high %v3320_v11, %v3320_v11 }
 0x36d   : > { %v2844_v40 = vpop.eup %2843  ;;  %1358 = vst.msk [vmem:[#allocation4 + $0xb8] sm:$0xff] %vm855_vm2, %v2842_v4  ;;  %2869 = vpow2.f32 %v1281_v30  ;;  %v1434_v5 = vrot.slane %v1420_v38, %v3295_v37  ;;  %v1291_v14 = vmul.f32 1.442695, %v1249_v24  ;;  %v1293_v45 = vmul.f32 1.442695, %v1250_v28 }
 0x36e   : > { %v2846_v42 = vpop.eup %2845  ;;  %1359 = vst.msk [vmem:[#allocation4 + $0xc0] sm:$0xff] %vm855_vm2, %v2844_v40  ;;  %2871 = vpow2.f32 %v1283_v34  ;;  %v1386_v46 = vcombine.high %v1378_v19, %v1378_v19  ;;  %v1295_v3 = vmul.f32 1.442695, %v1251_v29  ;;  %v3439_v49 = vrot.slane %v1435_v41, %v3295_v37 }
 0x36f   : > { %v2848_v47 = vpop.eup %2847  ;;  %1360 = vst.msk [vmem:[#allocation4 + $0xc8] sm:$0xff] %vm855_vm2, %v2846_v42  ;;  %2873 = vpow2.f32 %v1285_v51  ;;  %v3442_v11 = vrot.slane %v1434_v5, %v3295_v37  ;;  %v1436_v38 = vcombine.high %v1434_v5, %v1434_v5  ;;  %v3446_v57 = vrot.slane %v1378_v19, %v3295_v37 }
 0x370   : > { %v2850_v55 = vpop.eup %2849  ;;  %1361 = vst.msk [vmem:[#allocation4 + $0xd0] sm:$0xff] %vm855_vm2, %v2848_v47  ;;  %2875 = vpow2.f32 %v1287_v54  ;;  %v3449_v61 = vrot.slane %v1386_v46, %v3295_v37  ;;  %v1297_v63 = vmul.f32 1.442695, %v1252_v32  ;;  %v1299_v0 = vmul.f32 1.442695, %v1253_v33 }
 0x371   : > { %v2852_v62 = vpop.eup %2851  ;;  %1362 = vst.msk [vmem:[#allocation4 + $0xd8] sm:$0xff] %vm855_vm2, %v2850_v55  ;;  %2877 = vpow2.f32 %v1289_v18  ;;  %v1387_v1 = vcombine.high %v1385_v39, %v1385_v39  ;;  %v3454_v48 = vrot.slane %v1436_v38, %v3295_v37  ;;  %v1301_v56 = vmul.f32 1.442695, %v1254_v36 }
 0x372   : > { %v2854_v60 = vpop.eup %2853  ;;  %1363 = vst.msk [vmem:[#allocation4 + $0xe0] sm:$0xff] %vm855_vm2, %v2852_v62  ;;  %2879 = vpow2.f32 %v1291_v14  ;;  %v3460_v17 = vrot.slane %v1385_v39, %v3295_v37  ;;  %v1850_v26 = vsel %vm1848_vm3, %v3250_v7, 0.0  ;;  %v2067_v31 = vsel %vm2065_vm9, %v3250_v7, 0.0 }
 0x373   : > { %v2856_v2 = vpop.eup %2855  ;;  %1364 = vst.msk [vmem:[#allocation4 + $0xe8] sm:$0xff] %vm855_vm2, %v2854_v60  ;;  %2881 = vpow2.f32 %v1293_v45  ;;  %v3465_v58 = vrot.slane %v1387_v1, %v3295_v37  ;;  %v1854_v29 = vsel %vm1818_vm12, %v1850_v26, 0.0  ;;  %v2071_v35 = vsel %vm1818_vm12, %v2067_v31, 0.0 }
 0x374   : > { %v2858_v12 = vpop.eup %2857  ;;  %1365 = vst.msk [vmem:[#allocation4 + $0xf0] sm:$0xff] %vm855_vm2, %v2856_v2  ;;  %2883 = vpow2.f32 %v1295_v3  ;;  %v1816_v4 = vsel %vm1815_vm4, %v3255_v10, 0.0  ;;  %v1849_v40 = vsel %vm1848_vm3, %v3255_v10, 0.0  ;;  %v1880_v41 = vsel %vm1879_vm5, %v3255_v10, 0.0 }
 0x375   : > { %v2860_v13 = vpop.eup %2859  ;;  %1366 = vst.msk [vmem:[#allocation4 + $0xf8] sm:$0xff] %vm855_vm2, %v2858_v12  ;;  %2885 = vpow2.f32 %v1297_v63  ;;  %v1819_v39 = vsel %vm1818_vm12, %v1816_v4, 0.0  ;;  %v1851_v18 = vsel %vm1818_vm12, %v1849_v40, 0.0  ;;  %v1817_v5 = vsel %vm1815_vm4, %v3250_v7, 0.0 }
 0x376   : > { %v2862_v15 = vpop.eup %2861  ;;  %2887 = vpow2.f32 %v1299_v0  ;;  %1335 = vst.msk [vmem:[#allocation4] sm:$0xff] %vm855_vm2, %v2860_v13  ;;  %v1882_v42 = vsel %vm1818_vm12, %v1880_v41, 0.0  ;;  %v1822_v14 = vsel %vm1818_vm12, %v1817_v5, 0.0  ;;  %v1911_v45 = vsel %vm1910_vm6, %v3255_v10, 0.0 }
 0x377   : > { %v2864_v16 = vpop.eup %2863  ;;  %2889 = vpow2.f32 %v1301_v56  ;;  %1336 = vst.msk [vmem:[#allocation4 + $0x8] sm:$0xff] %vm855_vm2, %v2862_v15  ;;  %v1881_v46 = vsel %vm1879_vm5, %v3250_v7, 0.0  ;;  %v1913_v47 = vsel %vm1818_vm12, %v1911_v45, 0.0  ;;  %v1942_v55 = vsel %vm1941_vm7, %v3255_v10, 0.0 }
 0x378   : > { %v2866_v21 = vpop.eup %2865  ;;  %1337 = vst.msk [vmem:[#allocation4 + $0x10] sm:$0xff] %vm855_vm2, %v2864_v16  ;;  %v1885_v3 = vsel %vm1818_vm12, %v1881_v46, 0.0  ;;  %v1912_v38 = vsel %vm1910_vm6, %v3250_v7, 0.0  ;;  %v1696_v62 = vrot.slane %v3427_v50, %v3153_v52  ;;  %v1944_v63 = vsel %vm1818_vm12, %v1942_v55, 0.0 }
 0x379   : > { %v2868_v24 = vpop.eup %2867  ;;  %1338 = vst.msk [vmem:[#allocation4 + $0x18] sm:$0xff] %vm855_vm2, %v2866_v21  ;;  %v1916_v1 = vsel %vm1818_vm12, %v1912_v38, 0.0  ;;  %v1973_v12 = vsel %vm1972_vm8, %v3255_v10, 0.0  ;;  %v1943_v13 = vsel %vm1941_vm7, %v3250_v7, 0.0  ;;  %vm2003_vm9 = vcmp.eq.s32.totalorder %v3253_v9, 6 }
 0x37a   : > { %v2870_v27 = vpop.eup %2869  ;;  %1339 = vst.msk [vmem:[#allocation4 + $0x20] sm:$0xff] %vm855_vm2, %v2868_v24  ;;  %v1700_v15 = vrot.slane %v3439_v49, %v3153_v52  ;;  %v1465_v16 = vcombine.high %v3427_v50, %v3427_v50  ;;  %v1975_v21 = vsel %vm1818_vm12, %v1973_v12, 0.0  ;;  %v1467_v31 = vcombine.high %v3439_v49, %v3439_v49 }
 0x37b   : > { %v2872_v28 = vpop.eup %2871  ;;  %1340 = vst.msk [vmem:[#allocation4 + $0x28] sm:$0xff] %vm855_vm2, %v2870_v27  ;;  %v1947_v27 = vsel %vm1818_vm12, %v1943_v13, 0.0  ;;  %v2005_v4 = vsel %vm2003_vm9, %v3250_v7, 0.0  ;;  %v1712_v45 = vrot.slane %v3442_v11, %v3153_v52  ;;  %v2316_v46 = vsub.f32 0.0, %v3168_v59 }
 0x37c   : > { %v2874_v37 = vpop.eup %2873  ;;  %1341 = vst.msk [vmem:[#allocation4 + $0x30] sm:$0xff] %vm855_vm2, %v2872_v28  ;;  %v1704_v50 = vrot.slane %v1465_v16, %v3153_v52  ;;  %v1708_v49 = vrot.slane %v1467_v31, %v3153_v52  ;;  %vm2220_vm3 = vcmp.eq.s32.totalorder %v3253_v9, 13 }
 0x37d   : > { %v2876_v30 = vpop.eup %2875  ;;  %1342 = vst.msk [vmem:[#allocation4 + $0x38] sm:$0xff] %vm855_vm2, %v2874_v37  ;;  %1855 = vadd.xlane.f32.xlu0 %v1854_v29  ;;  %v2004_v29 = vsel %vm2003_vm9, %v3255_v10, 0.0  ;;  %v2318_v12 = vmul.f32 1.442695, %v2316_v46 }
 0x37e   : > { %v2878_v32 = vpop.eup %2877  ;;  %1343 = vst.msk [vmem:[#allocation4 + $0x40] sm:$0xff] %vm855_vm2, %v2876_v30  ;;  %v1974_v30 = vsel %vm1972_vm8, %v3250_v7, 0.0 }
 0x37f   : > { %v2880_v33 = vpop.eup %2879  ;;  %1344 = vst.msk [vmem:[#allocation4 + $0x48] sm:$0xff] %vm855_vm2, %v2878_v32  ;;  %v2006_v32 = vsel %vm1818_vm12, %v2004_v29, 0.0  ;;  %2891 = vpow2.f32 %v2318_v12 }
 0x380   : > { %v2882_v34 = vpop.eup %2881  ;;  %1345 = vst.msk [vmem:[#allocation4 + $0x50] sm:$0xff] %vm855_vm2, %v2880_v33 }
 0x381   : > { %v2884_v36 = vpop.eup %2883  ;;  %1346 = vst.msk [vmem:[#allocation4 + $0x58] sm:$0xff] %vm855_vm2, %v2882_v34  ;;  %2072 = vadd.xlane.f32.xlu0 %v2071_v35  ;;  %v1978_v35 = vsel %vm1818_vm12, %v1974_v30, 0.0 }
 0x382   : > { %v2886_v51 = vpop.eup %2885  ;;  %1347 = vst.msk [vmem:[#allocation4 + $0x60] sm:$0xff] %vm855_vm2, %v2884_v36 }
 0x383   : > { %v2888_v54 = vpop.eup %2887  ;;  %1348 = vst.msk [vmem:[#allocation4 + $0x68] sm:$0xff] %vm855_vm2, %v2886_v51 }
 0x384   : > { %v2890_v19 = vpop.eup %2889  ;;  %1349 = vst.msk [vmem:[#allocation4 + $0x70] sm:$0xff] %vm855_vm2, %v2888_v54  ;;  %v2035_v54 = vsel %vm2034_vm11, %v3255_v10, 0.0 }
 0x385   : > { %1350 = vst.msk [vmem:[#allocation4 + $0x78] sm:$0xff] %vm855_vm2, %v2890_v19  ;;  %1820 = vadd.xlane.f32.xlu0 %v1819_v39  ;;  %v2037_v19 = vsel %vm1818_vm12, %v2035_v54, 0.0 }
 0x389   : > { %1852 = vadd.xlane.f32.xlu0 %v1851_v18  ;;  %1823 = vadd.xlane.f32.xlu1 %v1822_v14  ;;  %v2009_v18 = vsel %vm1818_vm12, %v2005_v4, 0.0  ;;  %v2036_v14 = vsel %vm2034_vm11, %v3250_v7, 0.0 }
 0x38a   : > { %v2040_v38 = vsel %vm1818_vm12, %v2036_v14, 0.0 }
 0x38d   : > { %1883 = vadd.xlane.f32.xlu0 %v1882_v42  ;;  %1886 = vadd.xlane.f32.xlu1 %v1885_v3  ;;  %v2097_v42 = vsel %vm2096_vm13, %v3255_v10, 0.0 }
 0x391   : > { %1914 = vadd.xlane.f32.xlu0 %v1913_v47  ;;  %1917 = vadd.xlane.f32.xlu1 %v1916_v1  ;;  %v2099_v47 = vsel %vm1818_vm12, %v2097_v42, 0.0  ;;  %v1716_v1 = vrot.slane %v3454_v48, %v3153_v52 }
 0x395   : > { %1945 = vadd.xlane.f32.xlu0 %v1944_v63  ;;  %1948 = vadd.xlane.f32.xlu1 %v1947_v27  ;;  %v2159_v27 = vsel %vm2158_vm15, %v3255_v10, 0.0 }
 0x396   : > { %v2161_v30 = vsel %vm1818_vm12, %v2159_v27, 0.0 }
 0x397   : > { %v1576_v60 = vpop.permute.xlu1 %1575  ;;  %v1572_v0 = vpop.permute.xlu0 %1571 }
 0x398   : > { %v1758_v2 = vmul.f32 %v1696_v62, %v1576_v60  ;;  %v1757_v56 = vmul.f32 %v1696_v62, %v1572_v0  ;;  %v2128_v60 = vsel %vm2127_vm14, %v3255_v10, 0.0  ;;  %v2098_v0 = vsel %vm2096_vm13, %v3250_v7, 0.0 }
 0x399   : > { %1976 = vadd.xlane.f32.xlu0 %v1975_v21  ;;  %1979 = vadd.xlane.f32.xlu1 %v1978_v35  ;;  %v2130_v13 = vsel %vm1818_vm12, %v2128_v60, 0.0  ;;  %v2102_v21 = vsel %vm1818_vm12, %v2098_v0, 0.0  ;;  %v2190_v35 = vsel %vm2189_vm0, %v3255_v10, 0.0 }
 0x39a   : > { %1790 = vst.msk [vmem:[#allocation5 + $0x88] sm:$0xff] %vm855_vm2, %v1758_v2  ;;  %1789 = vst.msk [vmem:[#allocation5 + $0x80] sm:$0xff] %vm855_vm2, %v1757_v56  ;;  %v1466_v2 = vcombine.high %v3442_v11, %v3442_v11  ;;  %v2317_v56 = vsub.f32 0.0, %v3155_v53  ;;  %v2129_v11 = vsel %vm2127_vm14, %v3250_v7, 0.0 }
 0x39b   : > { %v1588_v24 = vpop.permute.xlu1 %1587  ;;  %v1584_v26 = vpop.permute.xlu0 %1583 }
 0x39c   : > { %v1760_v28 = vmul.f32 %v1700_v15, %v1588_v24  ;;  %v1759_v37 = vmul.f32 %v1700_v15, %v1584_v26  ;;  %v2320_v29 = vmul.f32 1.442695, %v2317_v56 }
 0x39d   : > { %2007 = vadd.xlane.f32.xlu0 %v2006_v32  ;;  %2010 = vadd.xlane.f32.xlu1 %v2009_v18  ;;  %v2133_v32 = vsel %vm1818_vm12, %v2129_v11, 0.0  ;;  %v2191_v18 = vsel %vm2189_vm0, %v3250_v7, 0.0 }
 0x39e   : > { %1792 = vst.msk [vmem:[#allocation5 + $0x98] sm:$0xff] %vm855_vm2, %v1760_v28  ;;  %1791 = vst.msk [vmem:[#allocation5 + $0x90] sm:$0xff] %vm855_vm2, %v1759_v37  ;;  %v1720_v28 = vrot.slane %v1466_v2, %v3153_v52  ;;  %v1468_v37 = vcombine.high %v3454_v48, %v3454_v48  ;;  %v2160_v48 = vsel %vm2158_vm15, %v3250_v7, 0.0  ;;  %2893 = vpow2.f32 %v2320_v29 }
 0x39f   : > { %v1600_v33 = vpop.permute.xlu1 %1599  ;;  %v1596_v34 = vpop.permute.xlu0 %1595  ;;  %v2195_v46 = vsel %vm1818_vm12, %v2191_v18, 0.0 }
 0x3a0   : > { %v1762_v36 = vmul.f32 %v1704_v50, %v1600_v33  ;;  %v1761_v51 = vmul.f32 %v1704_v50, %v1596_v34 }
 0x3a1   : > { %2038 = vadd.xlane.f32.xlu0 %v2037_v19  ;;  %2041 = vadd.xlane.f32.xlu1 %v2040_v38  ;;  %v2222_v38 = vsel %vm2220_vm3, %v3250_v7, 0.0 }
 0x3a2   : > { %1794 = vst.msk [vmem:[#allocation5 + $0xa8] sm:$0xff] %vm855_vm2, %v1762_v36  ;;  %1793 = vst.msk [vmem:[#allocation5 + $0xa0] sm:$0xff] %vm855_vm2, %v1761_v51  ;;  %v1724_v36 = vrot.slane %v1468_v37, %v3153_v52  ;;  %v2192_v51 = vsel %vm1818_vm12, %v2190_v35, 0.0  ;;  %v2226_v9 = vsel %vm1818_vm12, %v2222_v38, 0.0  ;;  %v1684_v37 = vrot.slane %v3465_v58, %v3153_v52  ;;  %v1807_v35 = vld [vmem:[#allocation4] sm:$0xff]  ;;  %v1840_v38 = vld [vmem:[#allocation4 + $0x18] sm:$0xff] }
 0x3a3   : > { %v1612_v39 = vpop.permute.xlu1 %1611  ;;  %v1608_v40 = vpop.permute.xlu0 %1607 }
 0x3a4   : > { %v1764_v41 = vmul.f32 %v1708_v49, %v1612_v39  ;;  %v1763_v5 = vmul.f32 %v1708_v49, %v1608_v40  ;;  %v2164_v49 = vsel %vm1818_vm12, %v2160_v48, 0.0  ;;  %v2221_v40 = vsel %vm2220_vm3, %v3255_v10, 0.0 }
 0x3a5   : > { %2100 = vadd.xlane.f32.xlu0 %v2099_v47  ;;  %2103 = vadd.xlane.f32.xlu1 %v2102_v21  ;;  %v2223_v42 = vsel %vm1818_vm12, %v2221_v40, 0.0 }
 0x3a6   : > { %1796 = vst.msk [vmem:[#allocation5 + $0xb8] sm:$0xff] %vm855_vm2, %v1764_v41  ;;  %1795 = vst.msk [vmem:[#allocation5 + $0xb0] sm:$0xff] %vm855_vm2, %v1763_v5  ;;  %v1664_v41 = vrot.slane %v3446_v57, %v3153_v52  ;;  %v1416_v5 = vcombine.high %v3446_v57, %v3446_v57  ;;  %v1668_v57 = vrot.slane %v3449_v61, %v3153_v52 }
 0x3a7   : > { %v1624_v3 = vpop.permute.xlu1 %1623  ;;  %v1620_v55 = vpop.permute.xlu0 %1619 }
 0x3a8   : > { %v1766_v62 = vmul.f32 %v1712_v45, %v1624_v3  ;;  %v1765_v63 = vmul.f32 %v1712_v45, %v1620_v55  ;;  %v2252_v55 = vsel %vm2251_vm10, %v3255_v10, 0.0  ;;  %v1418_v10 = vcombine.high %v3449_v61, %v3449_v61 }
 0x3a9   : > { %2131 = vadd.xlane.f32.xlu0 %v2130_v13  ;;  %2134 = vadd.xlane.f32.xlu1 %v2133_v32  ;;  %v1419_v32 = vcombine.high %v3465_v58, %v3465_v58  ;;  %vm1836_vm10 = vcmask 516096  }
 0x3aa   : > { %1798 = vst.msk [vmem:[#allocation5 + $0xc8] sm:$0xff] %vm855_vm2, %v1766_v62  ;;  %1797 = vst.msk [vmem:[#allocation5 + $0xc0] sm:$0xff] %vm855_vm2, %v1765_v63  ;;  %v1672_v62 = vrot.slane %v1416_v5, %v3153_v52  ;;  %v2254_v63 = vsel %vm1818_vm12, %v2252_v55, 0.0  ;;  %v1676_v12 = vrot.slane %v1418_v10, %v3153_v52 }
 0x3ab   : > { %v1636_v15 = vpop.permute.xlu1 %1635  ;;  %v1632_v16 = vpop.permute.xlu0 %1631 }
 0x3ac   : > { %v1768_v24 = vmul.f32 %v1716_v1, %v1636_v15  ;;  %v1767_v26 = vmul.f32 %v1716_v1, %v1632_v16  ;;  %v2892_v1 = vpop.eup %2891 }
 0x3ad   : > { %2162 = vadd.xlane.f32.xlu0 %v2161_v30  ;;  %2165 = vadd.xlane.f32.xlu1 %v2164_v49  ;;  %v2894_v13 = vpop.eup %2893  ;;  %v2322_v15 = vadd.f32 1.0, %v2892_v1 }
 0x3ae   : > { %1800 = vst.msk [vmem:[#allocation5 + $0xd8] sm:$0xff] %vm855_vm2, %v1768_v24  ;;  %1799 = vst.msk [vmem:[#allocation5 + $0xd0] sm:$0xff] %vm855_vm2, %v1767_v26  ;;  %v1680_v26 = vrot.slane %v3460_v17, %v3153_v52  ;;  %v2323_v27 = vadd.f32 1.0, %v2894_v13 }
 0x3af   : > { %v1648_v50 = vpop.permute.xlu1 %1647  ;;  %v1644_v31 = vpop.permute.xlu0 %1643  ;;  %2895 = vrcp.f32 %v2322_v15 }
 0x3b0   : > { %v1770_v33 = vmul.f32 %v1720_v28, %v1648_v50  ;;  %v1769_v34 = vmul.f32 %v1720_v28, %v1644_v31  ;;  %2897 = vrcp.f32 %v2323_v27  ;;  %v2347_v27 = vld [vmem:[%s3099_s2 + $0x38] sm:$0xff] }
 0x3b1   : > { %2193 = vadd.xlane.f32.xlu0 %v2192_v51  ;;  %2196 = vadd.xlane.f32.xlu1 %v2195_v46 }
 0x3b2   : > { %1802 = vst.msk [vmem:[#allocation5 + $0xe8] sm:$0xff] %vm855_vm2, %v1770_v33  ;;  %1801 = vst.msk [vmem:[#allocation5 + $0xe0] sm:$0xff] %vm855_vm2, %v1769_v34  ;;  %2744 = vmatprep.subr.mxu0 %v2347_v27 }
 0x3b3   : > { %v1660_v54 = vpop.permute.xlu1 %1659  ;;  %v1656_v4 = vpop.permute.xlu0 %1655  ;;  %2745 = vmatpush3.msra.mxu0 %v2347_v27  ;;  %v2087_v27 = vld [vmem:[#allocation4 + $0x90] sm:$0xff] }
 0x3b4   : > { %v1772_v19 = vmul.f32 %v1724_v36, %v1660_v54  ;;  %v1771_v39 = vmul.f32 %v1724_v36, %v1656_v4  ;;  %v1809_v54 = vmul.f32 0.0, %v1807_v35  ;;  %v1963_v35 = vld [vmem:[#allocation4 + $0x50] sm:$0xff] }
 0x3b5   : > { %2224 = vadd.xlane.f32.xlu0 %v2223_v42  ;;  %2227 = vadd.xlane.f32.xlu1 %v2226_v9  ;;  %v1839_v42 = vld [vmem:[#allocation4 + $0x10] sm:$0xff]  ;;  %v1871_v9 = vld [vmem:[#allocation4 + $0x28] sm:$0xff] }
 0x3b6   : > { %1804 = vst.msk [vmem:[#allocation5 + $0xf8] sm:$0xff] %vm855_vm2, %v1772_v19  ;;  %1803 = vst.msk [vmem:[#allocation5 + $0xf0] sm:$0xff] %vm855_vm2, %v1771_v39 }
 0x3b7   : > { %v1480_v14 = vpop.permute.xlu1 %1479  ;;  %v1476_v45 = vpop.permute.xlu0 %1475 }
 0x3b8   : > { %v1742_v47 = vmul.f32 %v1664_v41, %v1480_v14  ;;  %v1741_v3 = vmul.f32 %v1664_v41, %v1476_v45  ;;  %v1808_v41 = vld [vmem:[#allocation4 + $0x8] sm:$0xff] }
 0x3b9   : > { %2255 = vadd.xlane.f32.xlu0 %v2254_v63  ;;  %2258 = vadd.xlane.f32.xlu1 %v3274_v20 }
 0x3ba   : > { %1774 = vst.msk [vmem:[#allocation5 + $0x8] sm:$0xff] %vm855_vm2, %v1742_v47  ;;  %1773 = vst.msk [vmem:[#allocation5] sm:$0xff] %vm855_vm2, %v1741_v3  ;;  %v1810_v47 = vmul.f32 0.0, %v1808_v41 }
 0x3bb   : > { %v1488_v60 = vpop.permute.xlu1 %1487  ;;  %v1500_v0 = vpop.permute.xlu0 %1499 }
 0x3bc   : > { %v1743_v7 = vmul.f32 %v1668_v57, %v1488_v60  ;;  %v1745_v2 = vmul.f32 %v1672_v62, %v1500_v0  ;;  %v2896_v51 = vpop.eup %2895  ;;  %v1870_v60 = vld [vmem:[#allocation4 + $0x20] sm:$0xff] }
 0x3bd   : > { %2286 = vadd.xlane.f32.xlu0 %v3279_v22  ;;  %2069 = vadd.xlane.f32.xlu1 %v3282_v23  ;;  %v1417_v23 = vcombine.high %v3460_v17, %v3460_v17  ;;  %v1692_v17 = vrot.slane %v1419_v32, %v3153_v52  ;;  %v2328_v58 = vmul.f32 %v2896_v51, %v3168_v59  ;;  %v2898_v18 = vpop.eup %2897 }
 0x3be   : > { %1775 = vst.msk [vmem:[#allocation5 + $0x10] sm:$0xff] %vm855_vm2, %v1743_v7  ;;  %1777 = vst.msk [vmem:[#allocation5 + $0x20] sm:$0xff] %vm855_vm2, %v1745_v2 }
 0x3bf   : > { %v1492_v56 = vpop.permute.xlu1 %1491  ;;  %v1512_v61 = vpop.permute.xlu0 %1511  ;;  %v1688_v31 = vrot.slane %v1417_v23, %v3153_v52  ;;  %v2329_v52 = vmul.f32 %v2898_v18, %v3155_v53 }
 0x3c0   : > { %v1744_v16 = vmul.f32 %v1668_v57, %v1492_v56  ;;  %v1747_v21 = vmul.f32 %v1676_v12, %v1512_v61  ;;  %v1902_v61 = vld [vmem:[#allocation4 + $0x38] sm:$0xff] }
 0x3c1   : > { %2289 = vadd.xlane.f32.xlu1 %v3288_v25  ;;  %v1811_v25 = vld [vmem:[#allocation5] sm:$0xff]  ;;  %v1812_v45 = vld [vmem:[#allocation5 + $0x8] sm:$0xff] }
 0x3c2   : > { %1776 = vst.msk [vmem:[#allocation5 + $0x18] sm:$0xff] %vm855_vm2, %v1744_v16  ;;  %1779 = vst.msk [vmem:[#allocation5 + $0x30] sm:$0xff] %vm855_vm2, %v1747_v21  ;;  %v3673_v40 = vadd.f32 %v1811_v25, %v1809_v54  ;;  %v3680_v3 = vadd.f32 %v1812_v45, %v1810_v47  ;;  %v2340_v25 = vld [vmem:[%s3099_s2] sm:$0xff]  ;;  %v1964_v54 = vld [vmem:[#allocation4 + $0x58] sm:$0xff] }
 0x3c3   : > { %v1504_v24 = vpop.permute.xlu1 %1503  ;;  %v2025_v45 = vld [vmem:[#allocation4 + $0x70] sm:$0xff] }
 0x3c4   : > { %v1746_v11 = vmul.f32 %v1672_v62, %v1504_v24  ;;  %v1524_v28 = vpop.permute.xlu0 %1523  ;;  %v1841_v46 = vmul.f32 %v1839_v42, %v3673_v40  ;;  %v1842_v63 = vmul.f32 %v1840_v38, %v3680_v3 }
 0x3c5   : > { %v1749_v22 = vmul.f32 %v1680_v26, %v1524_v28  ;;  %v1844_v59 = vld [vmem:[#allocation5 + $0x10] sm:$0xff]  ;;  %v1875_v1 = vld [vmem:[#allocation5 + $0x20] sm:$0xff] }
 0x3c6   : > { %1778 = vst.msk [vmem:[#allocation5 + $0x28] sm:$0xff] %vm855_vm2, %v1746_v11  ;;  %v3682_v55 = vadd.f32 %v1844_v59, %v1841_v46  ;;  %v2346_v11 = vld [vmem:[%s3099_s2 + $0x30] sm:$0xff]  ;;  %v1932_v28 = vld [vmem:[#allocation4 + $0x40] sm:$0xff] }
 0x3c7   : > { %1781 = vst.msk [vmem:[#allocation5 + $0x40] sm:$0xff] %vm855_vm2, %v1749_v22  ;;  %v1516_v20 = vpop.permute.xlu1 %1515  ;;  %2746 = vmatprep.subr.mxu0 %v2346_v11 }
 0x3c8   : > { %v1748_v29 = vmul.f32 %v1676_v12, %v1516_v20  ;;  %v1536_v30 = vpop.permute.xlu0 %1535  ;;  %v1872_v0 = vmul.f32 %v1870_v60, %v3682_v55  ;;  %v1901_v12 = vld [vmem:[#allocation4 + $0x30] sm:$0xff]  ;;  %v2345_v20 = vld [vmem:[%s3099_s2 + $0x28] sm:$0xff]  ;;  %2747 = vmatpush3.msra.mxu0 %v2346_v11 }
 0x3c9   : > { %v1751_v50 = vmul.f32 %v1684_v37, %v1536_v30  ;;  %v1845_v57 = vld [vmem:[#allocation5 + $0x18] sm:$0xff]  ;;  %v1906_v16 = vld [vmem:[#allocation5 + $0x30] sm:$0xff]  ;;  %2748 = vmatprep.subr.mxu0 %v2345_v20 }
 0x3ca   : > { %1780 = vst.msk [vmem:[#allocation5 + $0x38] sm:$0xff] %vm855_vm2, %v1748_v29  ;;  %v3686_v10 = vadd.f32 %v1845_v57, %v1842_v63  ;;  %v3689_v7 = vadd.f32 %v1875_v1, %v1872_v0  ;;  %v2344_v29 = vld [vmem:[%s3099_s2 + $0x20] sm:$0xff]  ;;  %2749 = vmatpush3.msra.mxu0 %v2345_v20  ;;  %v2026_v57 = vld [vmem:[#allocation4 + $0x78] sm:$0xff] }
 0x3cb   : > { %1783 = vst.msk [vmem:[#allocation5 + $0x50] sm:$0xff] %vm855_vm2, %v1751_v50  ;;  %v1528_v33 = vpop.permute.xlu1 %1527  ;;  %v1933_v50 = vld [vmem:[#allocation4 + $0x48] sm:$0xff]  ;;  %2750 = vmatprep.subr.mxu0 %v2344_v29  ;;  %v2056_v0 = vld [vmem:[#allocation4 + $0x80] sm:$0xff] }
 0x3cc   : > { %v1548_v34 = vpop.permute.xlu0 %1547  ;;  %v1750_v48 = vmul.f32 %v1680_v26, %v1528_v33  ;;  %v1873_v2 = vmul.f32 %v1871_v9, %v3686_v10  ;;  %v1903_v13 = vmul.f32 %v1901_v12, %v3689_v7  ;;  %2751 = vmatpush3.msra.mxu0 %v2344_v29 }
 0x3cd   : > { %v1753_v36 = vmul.f32 %v1688_v31, %v1548_v34  ;;  %v1876_v56 = vld [vmem:[#allocation5 + $0x28] sm:$0xff]  ;;  %v2342_v34 = vld [vmem:[%s3099_s2 + $0x10] sm:$0xff] }
 0x3ce   : > { %1782 = vst.msk [vmem:[#allocation5 + $0x48] sm:$0xff] %vm855_vm2, %v1750_v48  ;;  %v3693_v15 = vadd.f32 %v1876_v56, %v1873_v2  ;;  %v3695_v21 = vadd.f32 %v1906_v16, %v1903_v13  ;;  %v1937_v30 = vld [vmem:[#allocation5 + $0x40] sm:$0xff]  ;;  %v2057_v13 = vld [vmem:[#allocation4 + $0x88] sm:$0xff] }
 0x3cf   : > { %1785 = vst.msk [vmem:[#allocation5 + $0x60] sm:$0xff] %vm855_vm2, %v1753_v36  ;;  %v1540_v4 = vpop.permute.xlu1 %1539  ;;  %v2341_v36 = vld [vmem:[%s3099_s2 + $0x8] sm:$0xff]  ;;  %v2061_v56 = vld [vmem:[#allocation5 + $0x80] sm:$0xff] }
 0x3d0   : > { %v1560_v49 = vpop.permute.xlu0 %1559  ;;  %v1752_v19 = vmul.f32 %v1684_v37, %v1540_v4  ;;  %v1904_v24 = vmul.f32 %v1902_v61, %v3693_v15  ;;  %v1934_v22 = vmul.f32 %v1932_v28, %v3695_v21  ;;  %v2062_v28 = vld [vmem:[#allocation5 + $0x88] sm:$0xff] }
 0x3d1   : > { %v1755_v39 = vmul.f32 %v1692_v17, %v1560_v49  ;;  %v1907_v26 = vld [vmem:[#allocation5 + $0x38] sm:$0xff] }
 0x3d2   : > { %1784 = vst.msk [vmem:[#allocation5 + $0x58] sm:$0xff] %vm855_vm2, %v1752_v19  ;;  %2334 = vrot.lane.b32.xlu1 %v2329_v52, %s2941_s21  ;;  %v3702_v37 = vadd.f32 %v1907_v26, %v1904_v24  ;;  %v3705_v23 = vadd.f32 %v1937_v30, %v1934_v22 }
 0x3d3   : > { %1787 = vst.msk [vmem:[#allocation5 + $0x70] sm:$0xff] %vm855_vm2, %v1755_v39  ;;  %2332 = vrot.lane.b32.xlu0 %v2328_v58, %s2941_s21  ;;  %v1552_v5 = vpop.permute.xlu1 %1551  ;;  %v1994_v39 = vld [vmem:[#allocation4 + $0x60] sm:$0xff] }
 0x3d4   : > { %v1754_v14 = vmul.f32 %v1688_v31, %v1552_v5  ;;  %v2343_v31 = vld [vmem:[%s3099_s2 + $0x18] sm:$0xff]  ;;  %v1935_v32 = vmul.f32 %v1933_v50, %v3702_v37  ;;  %v1965_v48 = vmul.f32 %v1963_v35, %v3705_v23  ;;  %v1995_v5 = vld [vmem:[#allocation4 + $0x68] sm:$0xff] }
 0x3d5   : > { %v1938_v33 = vld [vmem:[#allocation5 + $0x48] sm:$0xff]  ;;  %2752 = vmatprep.subr.mxu0 %v2343_v31 }
 0x3d6   : > { %1786 = vst.msk [vmem:[#allocation5 + $0x68] sm:$0xff] %vm855_vm2, %v1754_v14  ;;  %2753 = vmatpush3.msra.mxu0 %v2343_v31  ;;  %v3712_v51 = vadd.f32 %v1938_v33, %v1935_v32  ;;  %v1999_v41 = vld [vmem:[#allocation5 + $0x60] sm:$0xff] }
 0x3d7   : > { %v1564_v62 = vpop.permute.xlu1 %1563  ;;  %2754 = vmatprep.subr.mxu0 %v2342_v34 }
 0x3d8   : > { %v1756_v53 = vmul.f32 %v1692_v17, %v1564_v62  ;;  %2755 = vmatpush3.msra.mxu0 %v2342_v34  ;;  %v1968_v17 = vld [vmem:[#allocation5 + $0x50] sm:$0xff]  ;;  %v1966_v49 = vmul.f32 %v1964_v54, %v3712_v51 }
 0x3d9   : > { %2756 = vmatprep.subr.mxu0 %v2341_v36  ;;  %v3715_v4 = vadd.f32 %v1968_v17, %v1965_v48  ;;  %v1969_v19 = vld [vmem:[#allocation5 + $0x58] sm:$0xff]  ;;  %v2092_v34 = vld [vmem:[#allocation5 + $0x90] sm:$0xff] }
 0x3da   : > { %1788 = vst.msk [vmem:[#allocation5 + $0x78] sm:$0xff] %vm855_vm2, %v1756_v53  ;;  %2757 = vmatpush3.msra.mxu0 %v2341_v36  ;;  %v3719_v18 = vadd.f32 %v1969_v19, %v1966_v49  ;;  %v2030_v38 = vld [vmem:[#allocation5 + $0x70] sm:$0xff]  ;;  %v2088_v48 = vld [vmem:[#allocation4 + $0x98] sm:$0xff] }
 0x3db   : > { %2758 = vmatprep.subr.mxu0 %v2340_v25  ;;  %v1996_v58 = vmul.f32 %v1994_v39, %v3715_v4 }
 0x3dc   : > { %2759 = vmatpush3.msra.mxu0 %v2340_v25  ;;  %v1997_v52 = vmul.f32 %v1995_v5, %v3719_v18  ;;  %v2093_v5 = vld [vmem:[#allocation5 + $0x98] sm:$0xff] }
 0x3dd   : > { %v3721_v42 = vadd.f32 %v1999_v41, %v1996_v58  ;;  %v2000_v14 = vld [vmem:[#allocation5 + $0x68] sm:$0xff] }
 0x3de   : > { %v3725_v59 = vadd.f32 %v2000_v14, %v1997_v52  ;;  %v2118_v52 = vld [vmem:[#allocation4 + $0xa0] sm:$0xff] }
 0x3df   : > { %v2027_v46 = vmul.f32 %v2025_v45, %v3721_v42 }
 0x3e0   : > { %v2028_v60 = vmul.f32 %v2026_v57, %v3725_v59 }
 0x3e1   : > { %v3727_v62 = vadd.f32 %v2030_v38, %v2027_v46  ;;  %v2031_v53 = vld [vmem:[#allocation5 + $0x78] sm:$0xff] }
 0x3e2   : > { %v3733_v9 = vadd.f32 %v2031_v53, %v2028_v60 }
 0x3e3   : > { %v2058_v1 = vmul.f32 %v2056_v0, %v3727_v62 }
 0x3e4   : > { %v2059_v61 = vmul.f32 %v2057_v13, %v3733_v9  ;;  %v2119_v13 = vld [vmem:[#allocation4 + $0xa8] sm:$0xff] }
 0x3e5   : > { %v3736_v16 = vadd.f32 %v2061_v56, %v2058_v1 }
 0x3e6   : > { %v3743_v29 = vadd.f32 %v2062_v28, %v2059_v61 }
 0x3e7   : > { %v2089_v20 = vmul.f32 %v2087_v27, %v3736_v16 }
 0x3e9   : > { %v3748_v35 = vadd.f32 %v2092_v34, %v2089_v20 }
 0x3eb   : > { %v2120_v38 = vmul.f32 %v2118_v52, %v3748_v35 }
 0x406   : > { %v1856_v47 = vpop.xlane.xlu0 %1855 }
 0x407   : > { %v1858_v12 = vmul.f32 %v1856_v47, %v3686_v10 }
 0x409   : > { %v1860_v11 = vsel %vm855_vm2, %v1858_v12, 0.0  ;;  %v2123_v12 = vld [vmem:[#allocation5 + $0xa0] sm:$0xff] }
 0x40a   : > { %v3729_v63 = vpop.xlane.xlu0 %2072  ;;  %v3764_v27 = vadd.f32 %v2123_v12, %v2120_v38  ;;  %v2180_v12 = vld [vmem:[#allocation4 + $0xc0] sm:$0xff] }
 0x40e   : > { %v1821_v2 = vpop.xlane.xlu0 %1820 }
 0x40f   : > { %v1825_v10 = vmul.f32 %v1821_v2, %v3673_v40  ;;  %v2090_v40 = vmul.f32 %v2088_v48, %v3743_v29 }
 0x411   : > { %v1827_v36 = vsel %vm855_vm2, %v1825_v10, 0.0  ;;  %v3757_v47 = vadd.f32 %v2093_v5, %v2090_v40  ;;  %v2150_v5 = vld [vmem:[#allocation4 + $0xb8] sm:$0xff] }
 0x412   : > { %v1853_v24 = vpop.xlane.xlu0 %1852  ;;  %v1824_v31 = vpop.xlane.xlu1 %1823 }
 0x413   : > { %v1857_v26 = vmul.f32 %v1853_v24, %v3682_v55  ;;  %v1826_v33 = vmul.f32 %v1824_v31, %v3680_v3 }
 0x415   : > { %v1859_v22 = vsel %vm855_vm2, %v1857_v26, 0.0  ;;  %v1828_v17 = vsel %vm855_vm2, %v1826_v33, 0.0  ;;  %v2124_v33 = vld [vmem:[#allocation5 + $0xa8] sm:$0xff] }
 0x416   : > { %v1861_v30 = vadd.f32 %v1860_v11, %v1859_v22  ;;  %v1884_v50 = vpop.xlane.xlu0 %1883  ;;  %v1829_v49 = vadd.f32 %v1828_v17, %v1827_v36  ;;  %v1887_v19 = vpop.xlane.xlu1 %1886  ;;  %v2121_v11 = vmul.f32 %v2119_v13, %v3757_v47 }
 0x417   : > { %v1888_v55 = vmul.f32 %v1884_v50, %v3689_v7  ;;  %v1889_v3 = vmul.f32 %v1887_v19, %v3693_v15 }
 0x418   : > { %v1862_v32 = vrot.slane %v1861_v30, 4  ;;  %v1830_v41 = vrot.slane %v1829_v49, 4  ;;  %v3772_v36 = vadd.f32 %v2124_v33, %v2121_v11 }
 0x419   : > { %v1890_v58 = vsel %vm855_vm2, %v1888_v55, 0.0  ;;  %v1891_v45 = vsel %vm855_vm2, %v1889_v3, 0.0  ;;  %v2149_v55 = vld [vmem:[#allocation4 + $0xb0] sm:$0xff] }
 0x41a   : > { %v1863_v25 = vadd.f32 %v1862_v32, %v1861_v30  ;;  %v1915_v54 = vpop.xlane.xlu0 %1914  ;;  %v1831_v57 = vadd.f32 %v1830_v41, %v1829_v49  ;;  %v1892_v60 = vadd.f32 %v1891_v45, %v1890_v58  ;;  %v1918_v53 = vpop.xlane.xlu1 %1917  ;;  %v2154_v41 = vld [vmem:[#allocation5 + $0xb0] sm:$0xff] }
 0x41b   : > { %v1919_v7 = vmul.f32 %v1915_v54, %v3695_v21  ;;  %v1920_v15 = vmul.f32 %v1918_v53, %v3702_v37 }
 0x41c   : > { %v1864_v39 = vrot.slane %v1863_v25, 2  ;;  %v1832_v2 = vrot.slane %v1831_v57, 2  ;;  %v1893_v56 = vrot.slane %v1892_v60, 4 }
 0x41d   : > { %v1921_v1 = vsel %vm855_vm2, %v1919_v7, 0.0  ;;  %v1922_v24 = vsel %vm855_vm2, %v1920_v15, 0.0 }
 0x41e   : > { %v1865_v14 = vadd.f32 %v1864_v39, %v1863_v25  ;;  %v1946_v46 = vpop.xlane.xlu0 %1945  ;;  %v1833_v28 = vadd.f32 %v1832_v2, %v1831_v57  ;;  %v1894_v22 = vadd.f32 %v1893_v56, %v1892_v60  ;;  %v1923_v20 = vadd.f32 %v1922_v24, %v1921_v1  ;;  %v1949_v10 = vpop.xlane.xlu1 %1948  ;;  %v2155_v56 = vld [vmem:[#allocation5 + $0xb8] sm:$0xff] }
 0x41f   : > { %v1950_v21 = vmul.f32 %v1946_v46, %v3705_v23  ;;  %v1951_v23 = vmul.f32 %v1949_v10, %v3712_v51  ;;  %v2151_v25 = vmul.f32 %v2149_v55, %v3764_v27  ;;  %v2152_v46 = vmul.f32 %v2150_v5, %v3772_v36 }
 0x420   : > { %v1866_v0 = vrot.slane %v1865_v14, 1  ;;  %v1834_v50 = vrot.slane %v1833_v28, 1  ;;  %v1895_v31 = vrot.slane %v1894_v22, 2  ;;  %v1924_v32 = vrot.slane %v1923_v20, 4 }
 0x421   : > { %v1952_v37 = vsel %vm855_vm2, %v1950_v21, 0.0  ;;  %v1953_v34 = vsel %vm855_vm2, %v1951_v23, 0.0  ;;  %v3780_v45 = vadd.f32 %v2154_v41, %v2151_v25  ;;  %v2157_v24 = vadd.f32 %v2155_v56, %v2152_v46 }
 0x422   : > { %v1867_v61 = vadd.f32 %v1866_v0, %v1865_v14  ;;  %v1977_v26 = vpop.xlane.xlu0 %1976  ;;  %v1835_v17 = vadd.f32 %v1834_v50, %v1833_v28  ;;  %v1896_v54 = vadd.f32 %v1895_v31, %v1894_v22  ;;  %v1925_v40 = vadd.f32 %v1924_v32, %v1923_v20  ;;  %v1980_v19 = vpop.xlane.xlu1 %1979  ;;  %v2185_v31 = vld [vmem:[#allocation5 + $0xc0] sm:$0xff]  ;;  %v2181_v32 = vld [vmem:[#allocation4 + $0xc8] sm:$0xff] }
 0x423   : > { %v1981_v30 = vmul.f32 %v1977_v26, %v3715_v4  ;;  %v1954_v49 = vadd.f32 %v1953_v34, %v1952_v37  ;;  %v1982_v4 = vmul.f32 %v1980_v19, %v3719_v18  ;;  %v2182_v26 = vmul.f32 %v2180_v12, %v3780_v45 }
 0x424   : > { %1868 = vst.msk [vmem:[#allocation6 + $0x1] sm:$0x1] %vm1836_vm10, %v1867_v61  ;;  %1837 = vst.msk [vmem:[#allocation6] sm:$0x1] %vm1836_vm10, %v1835_v17  ;;  %v1897_v58 = vrot.slane %v1896_v54, 1  ;;  %v1926_v3 = vrot.slane %v1925_v40, 2 }
 0x425   : > { %v1983_v51 = vsel %vm855_vm2, %v1981_v30, 0.0  ;;  %v1955_v7 = vrot.slane %v1954_v49, 4  ;;  %v1984_v52 = vsel %vm855_vm2, %v1982_v4, 0.0  ;;  %v2187_v34 = vadd.f32 %v2185_v31, %v2182_v26 }
 0x426   : > { %v2008_v48 = vpop.xlane.xlu0 %2007  ;;  %v1898_v38 = vadd.f32 %v1897_v58, %v1896_v54  ;;  %v1927_v57 = vadd.f32 %v1926_v3, %v1925_v40  ;;  %v1985_v18 = vadd.f32 %v1984_v52, %v1983_v51  ;;  %v2011_v53 = vpop.xlane.xlu1 %2010  ;;  %v2186_v58 = vld [vmem:[#allocation5 + $0xc8] sm:$0xff]  ;;  %v2211_v3 = vld [vmem:[#allocation4 + $0xd0] sm:$0xff] }
 0x427   : > { %v2012_v39 = vmul.f32 %v2008_v48, %v3721_v42  ;;  %v1956_v60 = vadd.f32 %v1955_v7, %v1954_v49  ;;  %v2013_v0 = vmul.f32 %v2011_v53, %v3725_v59  ;;  %v2183_v48 = vmul.f32 %v2181_v32, %v2157_v24 }
 0x428   : > { %1899 = vst.msk [vmem:[#allocation6 + $0x2] sm:$0x1] %vm1836_vm10, %v1898_v38  ;;  %v1928_v15 = vrot.slane %v1927_v57, 1  ;;  %v1986_v2 = vrot.slane %v1985_v18, 4  ;;  %v2213_v52 = vmul.f32 %v2211_v3, %v2187_v34 }
 0x429   : > { %v2014_v42 = vsel %vm855_vm2, %v2012_v39, 0.0  ;;  %v1957_v21 = vrot.slane %v1956_v60, 2  ;;  %v2015_v13 = vsel %vm855_vm2, %v2013_v0, 0.0  ;;  %v2188_v5 = vadd.f32 %v2186_v58, %v2183_v48 }
 0x42a   : > { %v2039_v14 = vpop.xlane.xlu0 %2038  ;;  %v1929_v11 = vadd.f32 %v1928_v15, %v1927_v57  ;;  %v1987_v22 = vadd.f32 %v1986_v2, %v1985_v18  ;;  %v2016_v20 = vadd.f32 %v2015_v13, %v2014_v42  ;;  %v2042_v59 = vpop.xlane.xlu1 %2041  ;;  %v2212_v15 = vld [vmem:[#allocation4 + $0xd8] sm:$0xff] }
 0x42b   : > { %v2043_v1 = vmul.f32 %v2039_v14, %v3727_v62  ;;  %v1958_v28 = vadd.f32 %v1957_v21, %v1956_v60  ;;  %v2044_v10 = vmul.f32 %v2042_v59, %v3733_v9  ;;  %v2214_v12 = vmul.f32 %v2212_v15, %v2188_v5 }
 0x42c   : > { %1930 = vst.msk [vmem:[#allocation6 + $0x3] sm:$0x1] %vm1836_vm10, %v1929_v11  ;;  %v1988_v30 = vrot.slane %v1987_v22, 2  ;;  %v2017_v50 = vrot.slane %v2016_v20, 4 }
 0x42d   : > { %v2045_v62 = vsel %vm855_vm2, %v2043_v1, 0.0  ;;  %v1959_v23 = vrot.slane %v1958_v28, 1  ;;  %v2046_v33 = vsel %vm855_vm2, %v2044_v10, 0.0  ;;  %v2216_v1 = vld [vmem:[#allocation5 + $0xd0] sm:$0xff]  ;;  %v2217_v10 = vld [vmem:[#allocation5 + $0xd8] sm:$0xff] }
 0x42e   : > { %v2101_v61 = vpop.xlane.xlu0 %2100  ;;  %v1989_v17 = vadd.f32 %v1988_v30, %v1987_v22  ;;  %v2018_v54 = vadd.f32 %v2017_v50, %v2016_v20  ;;  %v2047_v40 = vadd.f32 %v2046_v33, %v2045_v62  ;;  %v2104_v49 = vpop.xlane.xlu1 %2103  ;;  %v2218_v56 = vadd.f32 %v2216_v1, %v2213_v52 }
 0x42f   : > { %v2105_v37 = vmul.f32 %v2101_v61, %v3748_v35  ;;  %v1960_v25 = vadd.f32 %v1959_v23, %v1958_v28  ;;  %v2106_v35 = vmul.f32 %v2104_v49, %v3757_v47  ;;  %v2219_v50 = vadd.f32 %v2217_v10, %v2214_v12 }
 0x430   : > { %v1990_v51 = vrot.slane %v1989_v17, 1  ;;  %v2019_v4 = vrot.slane %v2018_v54, 2  ;;  %v2048_v39 = vrot.slane %v2047_v40, 4 }
 0x431   : > { %v2107_v9 = vsel %vm855_vm2, %v2105_v37, 0.0  ;;  %1961 = vst.msk [vmem:[#allocation6 + $0x4] sm:$0x1] %vm1836_vm10, %v1960_v25  ;;  %v2108_v7 = vsel %vm855_vm2, %v2106_v35, 0.0  ;;  %v2242_v37 = vld [vmem:[#allocation4 + $0xe0] sm:$0xff]  ;;  %v2243_v35 = vld [vmem:[#allocation4 + $0xe8] sm:$0xff] }
 0x432   : > { %v2132_v55 = vpop.xlane.xlu0 %2131  ;;  %v1991_v14 = vadd.f32 %v1990_v51, %v1989_v17  ;;  %v2020_v46 = vadd.f32 %v2019_v4, %v2018_v54  ;;  %v2049_v38 = vadd.f32 %v2048_v39, %v2047_v40  ;;  %v2109_v57 = vadd.f32 %v2108_v7, %v2107_v9  ;;  %v2135_v60 = vpop.xlane.xlu1 %2134  ;;  %v2247_v9 = vld [vmem:[#allocation5 + $0xe0] sm:$0xff] }
 0x433   : > { %v2136_v19 = vmul.f32 %v2132_v55, %v3764_v27  ;;  %v2137_v27 = vmul.f32 %v2135_v60, %v3772_v36  ;;  %v2244_v31 = vmul.f32 %v2242_v37, %v2218_v56  ;;  %v2245_v39 = vmul.f32 %v2243_v35, %v2219_v50 }
 0x434   : > { %1992 = vst.msk [vmem:[#allocation6 + $0x5] sm:$0x1] %vm1836_vm10, %v1991_v14  ;;  %v2021_v53 = vrot.slane %v2020_v46, 1  ;;  %v2050_v42 = vrot.slane %v2049_v38, 2  ;;  %v2110_v0 = vrot.slane %v2109_v57, 4 }
 0x435   : > { %v2138_v47 = vsel %vm855_vm2, %v2136_v19, 0.0  ;;  %v2139_v21 = vsel %vm855_vm2, %v2137_v27, 0.0  ;;  %v2249_v4 = vadd.f32 %v2247_v9, %v2244_v31  ;;  %v3817_v27 = vld [vmem:[%s602_s17] ss:$0 sm:$0xff]  ;;  %s2942_s17 = smov (!%p2667_p8), 32  }
 0x436   : > { %v2163_v41 = vpop.xlane.xlu0 %2162  ;;  %v2022_v13 = vadd.f32 %v2021_v53, %v2020_v46  ;;  %v2051_v61 = vadd.f32 %v2050_v42, %v2049_v38  ;;  %v2111_v26 = vadd.f32 %v2110_v0, %v2109_v57  ;;  %v2140_v11 = vadd.f32 %v2139_v21, %v2138_v47  ;;  %v2166_v28 = vpop.xlane.xlu1 %2165  ;;  %v2248_v47 = vld [vmem:[#allocation5 + $0xe8] sm:$0xff] }
 0x437   : > { %v2167_v18 = vmul.f32 %v2163_v41, %v3780_v45  ;;  %v2168_v45 = vmul.f32 %v2166_v28, %v2157_v24  ;;  %v2250_v53 = vadd.f32 %v2248_v47, %v2245_v39 }
 0x438   : > { %2023 = vst.msk [vmem:[#allocation6 + $0x6] sm:$0x1] %vm1836_vm10, %v2022_v13  ;;  %v2052_v20 = vrot.slane %v2051_v61, 1  ;;  %v2112_v59 = vrot.slane %v2111_v26, 2  ;;  %v2141_v62 = vrot.slane %v2140_v11, 4 }
 0x439   : > { %v2169_v36 = vsel %vm855_vm2, %v2167_v18, 0.0  ;;  %v2170_v23 = vsel %vm855_vm2, %v2168_v45, 0.0 }
 0x43a   : > { %v2194_v2 = vpop.xlane.xlu0 %2193  ;;  %v2053_v32 = vadd.f32 %v2052_v20, %v2051_v61  ;;  %v2113_v33 = vadd.f32 %v2112_v59, %v2111_v26  ;;  %v2142_v55 = vadd.f32 %v2141_v62, %v2140_v11  ;;  %v2171_v48 = vadd.f32 %v2170_v23, %v2169_v36  ;;  %v2197_v25 = vpop.xlane.xlu1 %2196 }
 0x43b   : > { %v2198_v22 = vmul.f32 %v2194_v2, %v2187_v34  ;;  %v2199_v34 = vmul.f32 %v2197_v25, %v2188_v5  ;;  %v2312_v26 = vmul.f32 %v3817_v27, %v3212_v44  ;;  %v2075_v20 = vmul.f32 %v3729_v63, %v3743_v29  ;;  %v2278_v44 = vld [vmem:[#allocation5 + $0xf0] sm:$0xff]  ;;  %v2279_v29 = vld [vmem:[#allocation5 + $0xf8] sm:$0xff] }
 0x43c   : > { %2054 = vst.msk [vmem:[#allocation6 + $0x7] sm:$0x1] %vm1836_vm10, %v2053_v32  ;;  %v2114_v54 = vrot.slane %v2113_v33, 1  ;;  %v2143_v40 = vrot.slane %v2142_v55, 2  ;;  %v2172_v49 = vrot.slane %v2171_v48, 4 }
 0x43d   : > { %v2200_v24 = vsel %vm855_vm2, %v2198_v22, 0.0  ;;  %v2201_v19 = vsel %vm855_vm2, %v2199_v34, 0.0  ;;  %v2274_v22 = vld [vmem:[#allocation4 + $0xf8] sm:$0xff]  ;;  %v2077_v34 = vsel %vm855_vm2, %v2075_v20, 0.0 }
 0x43e   : > { %v2225_v30 = vpop.xlane.xlu0 %2224  ;;  %v2115_v58 = vadd.f32 %v2114_v54, %v2113_v33  ;;  %v2144_v3 = vadd.f32 %v2143_v40, %v2142_v55  ;;  %v2173_v7 = vadd.f32 %v2172_v49, %v2171_v48  ;;  %v2202_v41 = vadd.f32 %v2201_v19, %v2200_v24  ;;  %v2228_v52 = vpop.xlane.xlu1 %2227 }
 0x43f   : > { %v2229_v17 = vmul.f32 %v2225_v30, %v2218_v56  ;;  %v2230_v14 = vmul.f32 %v2228_v52, %v2219_v50  ;;  %v2273_v56 = vld [vmem:[#allocation4 + $0xf0] sm:$0xff]  ;;  %v2276_v37 = vmul.f32 %v2274_v22, %v2250_v53 }
 0x440   : > { %2116 = vst.msk [vmem:[#allocation6 + $0x9] sm:$0x1] %vm1836_vm10, %v2115_v58  ;;  %v2145_v38 = vrot.slane %v2144_v3, 1  ;;  %v2174_v57 = vrot.slane %v2173_v7, 2  ;;  %v2203_v60 = vrot.slane %v2202_v41, 4  ;;  %v2275_v61 = vmul.f32 %v2273_v56, %v2249_v4 }
 0x441   : > { %v2231_v5 = vsel %vm855_vm2, %v2229_v17, 0.0  ;;  %v2232_v18 = vsel %vm855_vm2, %v2230_v14, 0.0  ;;  %v2281_v40 = vadd.f32 %v2279_v29, %v2276_v37 }
 0x442   : > { %v2256_v51 = vpop.xlane.xlu0 %2255  ;;  %v2146_v0 = vadd.f32 %v2145_v38, %v2144_v3  ;;  %v2175_v1 = vadd.f32 %v2174_v57, %v2173_v7  ;;  %v2204_v15 = vadd.f32 %v2203_v60, %v2202_v41  ;;  %v2233_v21 = vadd.f32 %v2232_v18, %v2231_v5  ;;  %v2259_v2 = vpop.xlane.xlu1 %2258 }
 0x443   : > { %v2260_v46 = vmul.f32 %v2256_v51, %v2249_v4  ;;  %v2261_v13 = vmul.f32 %v2259_v2, %v2250_v53  ;;  %v2303_v11 = vld [vmem:[#allocation6] sm:$0xff]  ;;  %v2280_v33 = vadd.f32 %v2278_v44, %v2275_v61  ;;  %v2313_v2 = vmul.f32 %v3817_v27, %v3210_v43 }
 0x444   : > { %2147 = vst.msk [vmem:[#allocation6 + $0xa] sm:$0x1] %vm1836_vm10, %v2146_v0  ;;  %v2176_v28 = vrot.slane %v2175_v1, 1  ;;  %v2205_v36 = vrot.slane %v2204_v15, 2  ;;  %v2234_v45 = vrot.slane %v2233_v21, 4  ;;  %v2314_v10 = vadd.f32 %v2312_v26, %v2303_v11 }
 0x445   : > { %v2262_v12 = vsel %vm855_vm2, %v2260_v46, 0.0  ;;  %v2263_v59 = vsel %vm855_vm2, %v2261_v13, 0.0 }
 0x446   : > { %v2287_v42 = vpop.xlane.xlu0 %2286  ;;  %v2177_v23 = vadd.f32 %v2176_v28, %v2175_v1  ;;  %v2206_v30 = vadd.f32 %v2205_v36, %v2204_v15  ;;  %v2235_v50 = vadd.f32 %v2234_v45, %v2233_v21  ;;  %v2264_v31 = vadd.f32 %v2263_v59, %v2262_v12  ;;  %v2070_v32 = vpop.xlane.xlu1 %2069 }
 0x447   : > { %v2074_v55 = vmul.f32 %v2070_v32, %v3736_v16  ;;  %v2291_v17 = vmul.f32 %v2287_v42, %v2280_v33 }
 0x448   : > { %2178 = vst.msk [vmem:[#allocation6 + $0xb] sm:$0x1] %vm1836_vm10, %v2177_v23  ;;  %v2207_v25 = vrot.slane %v2206_v30, 1  ;;  %v2236_v24 = vrot.slane %v2235_v50, 2  ;;  %v2265_v63 = vrot.slane %v2264_v31, 4 }
 0x449   : > { %v2076_v54 = vsel %vm855_vm2, %v2074_v55, 0.0  ;;  %v2293_v3 = vsel %vm855_vm2, %v2291_v17, 0.0 }
 0x44a   : > { %v2333_v62 = vpop.permute.xlu0 %2332  ;;  %v2208_v49 = vadd.f32 %v2207_v25, %v2206_v30  ;;  %v2237_v9 = vadd.f32 %v2236_v24, %v2235_v50  ;;  %v2266_v35 = vadd.f32 %v2265_v63, %v2264_v31  ;;  %v2078_v19 = vadd.f32 %v2077_v34, %v2076_v54  ;;  %v2290_v16 = vpop.xlane.xlu1 %2289 }
 0x44b   : > { %v2338_v48 = vmul.f32 %v2333_v62, %v2314_v10  ;;  %v2292_v51 = vmul.f32 %v2290_v16, %v2281_v40 }
 0x44c   : > { %2209 = vst.msk [vmem:[#allocation6 + $0xc] sm:$0x1] %vm1836_vm10, %v2208_v49  ;;  %v2238_v4 = vrot.slane %v2237_v9, 1  ;;  %v2267_v39 = vrot.slane %v2266_v35, 2  ;;  %v2079_v58 = vrot.slane %v2078_v19, 4 }
 0x44d   : > { %2760 = vmatprep.mubr.msk.f32.mxu0 %vm855_vm2, %v2338_v48  ;;  %v2294_v7 = vsel %vm855_vm2, %v2292_v51, 0.0 }
 0x44e   : > { %v2239_v41 = vadd.f32 %v2238_v4, %v2237_v9  ;;  %v2268_v52 = vadd.f32 %v2267_v39, %v2266_v35  ;;  %v2080_v5 = vadd.f32 %v2079_v58, %v2078_v19  ;;  %v2295_v14 = vadd.f32 %v2294_v7, %v2293_v3  ;;  %v2335_v13 = vpop.permute.xlu1 %2334 }
 0x450   : > { %2240 = vst.msk [vmem:[#allocation6 + $0xd] sm:$0x1] %vm1836_vm10, %v2239_v41  ;;  %v2269_v46 = vrot.slane %v2268_v52, 1  ;;  %v2081_v38 = vrot.slane %v2080_v5, 2  ;;  %v2296_v57 = vrot.slane %v2295_v14, 4 }
 0x452   : > { %v2270_v60 = vadd.f32 %v2269_v46, %v2268_v52  ;;  %v2082_v47 = vadd.f32 %v2081_v38, %v2080_v5  ;;  %v2297_v18 = vadd.f32 %v2296_v57, %v2295_v14 }
 0x454   : > { %2271 = vst.msk [vmem:[#allocation6 + $0xe] sm:$0x1] %vm1836_vm10, %v2270_v60  ;;  %v2083_v53 = vrot.slane %v2082_v47, 1  ;;  %v2298_v42 = vrot.slane %v2297_v18, 2 }
 0x456   : > { %v2084_v0 = vadd.f32 %v2083_v53, %v2082_v47  ;;  %v2299_v1 = vadd.f32 %v2298_v42, %v2297_v18 }
 0x458   : > { %2085 = vst.msk [vmem:[#allocation6 + $0x8] sm:$0x1] %vm1836_vm10, %v2084_v0  ;;  %v2300_v15 = vrot.slane %v2299_v1, 1 }
 0x45a   : > { %v2301_v21 = vadd.f32 %v2300_v15, %v2299_v1 }
 0x45c   : > { %2302 = vst.msk [vmem:[#allocation6 + $0xf] sm:$0x1] %vm1836_vm10, %v2301_v21 }
 0x463   : > { %v2304_v56 = vld [vmem:[#allocation6 + $0x8] sm:$0xff] }
 0x464   : > { %v2315_v12 = vadd.f32 %v2313_v2, %v2304_v56 }
 0x466   : > { %v2339_v61 = vmul.f32 %v2335_v13, %v2315_v12 }
 0x468   : > { %2761 = vmatmul.mubr.msk.f32.vlgmr.msra.gmra.mxu0 %vm855_vm2, %v2339_v61 }
 0x527   : > { %2434 = sbr.rel (%p2667_p8) target bundleno = 1444 (0x5a4), region = 76 }
 0x528   : > { %v2762_v26 = vpop.f32.mrf.mxu0 }
 0x529   : > { %2430 = vst.msk [vmem:[#allocation2 + $0x8] sm:$0xff] %vm630_vm1, %v2762_v26 }
 0x52a   : > { %v2420_v11 = vpop.f32.mrf.mxu0 }
 0x52b   : > { %2429 = vst.msk [vmem:[#allocation2] sm:$0xff] %vm630_vm1, %v2420_v11 }
 0x52c   : > { %2435 = vst.msk [vmem:[%s3104_s3] sm:$0xff] %vm630_vm1, %v2420_v11  ;;  %2436 = vst.msk [vmem:[%s3104_s3 + $0x8] sm:$0xff] %vm630_vm1, %v2762_v26  ;;  %2439 = vrot.lane.b32.xlu0 %v3107_v6, %s2942_s17  ;;  %vm2445_vm2 = vcmask 523520  }
 0x530   : > { %2441 = vrot.lane.b32.xlu0 %v3109_v8, %s2942_s17 }
 0x59e   : > { %v2440_v43 = vpop.permute.xlu0 %2439 }
 0x59f   : > { %2446 = vst.msk [vmem:[%s3104_s3] sm:$0xff] %vm2445_vm2, %v2440_v43 }
 0x5a2   : > { %v2442_v27 = vpop.permute.xlu0 %2441 }
 0x5a3   : > { %2447 = vst.msk [vmem:[%s3104_s3 + $0x8] sm:$0xff] %vm2445_vm2, %v2442_v27 }
 0x5a4 PF: > { %s3906_s2 = sld [smem:[#allocation10_spill]] }
 0x5a5   : > { %s3907_s21 = sld [smem:[#allocation8_spill]] }
 0x5a6   : > { %s3908_s22 = sld [smem:[#allocation9_spill]] }
 0x5a7   : > { %s3909_s23 = sld [smem:[#allocation11_spill]] }
 0x5a8   : > { %s3910_s24 = sld [smem:[#allocation12_spill]] }
 0x5aa   : > { %s22_s25 = sadd.s32 1, %s3906_s2  }
 0x5ab   : > { %p19_p9 = scmp.ge.s32.totalorder %s22_s25, 6  }
 0x5ad   :  { %21 = sbr.rel (!%p19_p9) target bundleno = 5 (0x5), region = 169 }

</bundles_post_ra>
